<compile_context>
chip_gen: v5e
topology: v5e:2x2
jax: 0.10.0
libtpu: 0.0.40
codegen_flags: <defaults>
</compile_context>

<pallas_src>
import functools

import jax
import jax.numpy as jnp
from jax.experimental import pallas as pl
from jax.experimental.pallas import tpu as pltpu

# --- CrossViT small-branch shapes the Residual blocks run at (tiny/demo) ---
DIM = 64                     # token dim
HEADS = 2
DIM_HEAD = 32
INNER = HEADS * DIM_HEAD     # 64
MLP_DIM = 4 * DIM            # 256
SEQ = 17                     # 16 patches + cls token
BATCH = 2
LN_EPS = 1e-5                # nn.LayerNorm default


# ------------------------------ shared math ------------------------------
def _layer_norm(x, g, b):
    mu = jnp.mean(x, axis=-1, keepdims=True)
    xc = x - mu
    var = jnp.mean(xc * xc, axis=-1, keepdims=True)
    return xc * jax.lax.rsqrt(var + LN_EPS) * g + b


def _gelu_tanh(x):
    # tanh-approx GELU: lowers to the EUP slot instead of a long VALU erf
    # polynomial.  |err| vs exact-erf nn.GELU() ~1e-3.
    # TODO(synk): swap back to exact erf if strict parity with nn.GELU() is needed.
    c = 0.7978845608028654   # sqrt(2/pi)
    return 0.5 * x * (1.0 + jnp.tanh(c * (x + 0.044715 * x * x * x)))


# ------------------------------ Pallas kernel ------------------------------
def residual_block_kernel(x_ref, ln1g_ref, ln1b_ref,
                          wq_ref, wk_ref, wv_ref, wo_ref, bo_ref,
                          ln2g_ref, ln2b_ref, w1_ref, b1_ref, w2_ref, b2_ref,
                          o_ref, *, heads, scale):
    x = x_ref[0]                                             # (N, D) one example
    # ---------- Residual #1:  x + Attention(LayerNorm(x)) ----------
    xn = _layer_norm(x, ln1g_ref[...], ln1b_ref[...])
    proj = jnp.zeros_like(x)
    for h in range(heads):                                   # static, heads == 2
        q = jnp.dot(xn, wq_ref[h], preferred_element_type=jnp.float32)  # (N, dh)
        k = jnp.dot(xn, wk_ref[h], preferred_element_type=jnp.float32)
        v = jnp.dot(xn, wv_ref[h], preferred_element_type=jnp.float32)
        s = jnp.dot(q, k.T, preferred_element_type=jnp.float32) * scale  # (N, N)
        s = s - jnp.max(s, axis=-1, keepdims=True)
        p = jnp.exp(s)
        p = p / jnp.sum(p, axis=-1, keepdims=True)
        ctx = jnp.dot(p, v, preferred_element_type=jnp.float32)          # (N, dh)
        # merge_heads folded into the per-head slice of the output projection
        proj = proj + jnp.dot(ctx, wo_ref[h], preferred_element_type=jnp.float32)
    y = x + proj + bo_ref[...]                               # residual add #1
    # ---------- Residual #2:  y + FeedForward(LayerNorm(y)) ----------
    yn = _layer_norm(y, ln2g_ref[...], ln2b_ref[...])
    hdn = _gelu_tanh(jnp.dot(yn, w1_ref[...], preferred_element_type=jnp.float32)
                     + b1_ref[...])
    ff = jnp.dot(hdn, w2_ref[...], preferred_element_type=jnp.float32) + b2_ref[...]
    o_ref[0] = y + ff                                        # residual add #2
    # nn.Dropout layers are identity at inference.


# ------------------------------ host-side glue ------------------------------
def _split_heads(params):
    # Host-side weight re-layout (free): to_qkv columns are [q | k | v], each
    # chunk head-major, so the kernel gets contiguous per-head operands and
    # never lane-slices activations at 32-lane offsets.
    w = params['to_qkv_w'].reshape(DIM, 3, HEADS, DIM_HEAD)
    wq = jnp.transpose(w[:, 0], (1, 0, 2))                   # (heads, D, dh)
    wk = jnp.transpose(w[:, 1], (1, 0, 2))
    wv = jnp.transpose(w[:, 2], (1, 0, 2))
    wo = params['to_out_w'].reshape(HEADS, DIM_HEAD, DIM)    # rows are head-major
    return wq, wk, wv, wo


def residual_attention_ff(params, x):
    """out = Residual(PreNorm(FF))( Residual(PreNorm(Attn))(x) ) in one pallas_call."""
    b, n, d = x.shape
    wq, wk, wv, wo = _split_heads(params)

    kern = functools.partial(residual_block_kernel, heads=HEADS,
                             scale=DIM_HEAD ** -0.5)

    def tok_spec():
        return pl.BlockSpec((1, n, d), lambda i: (i, 0, 0))

    def rep_spec(shape):                       # whole array, same block every step
        nd = len(shape)
        return pl.BlockSpec(shape, lambda i, _nd=nd: (0,) * _nd)

    args = (x,
            params['ln1_g'], params['ln1_b'],
            wq, wk, wv, wo, params['to_out_b'],
            params['ln2_g'], params['ln2_b'],
            params['ff_w1'], params['ff_b1'], params['ff_w2'], params['ff_b2'])

    return pl.pallas_call(
        kern,
        out_shape=jax.ShapeDtypeStruct((b, n, d), jnp.float32),
        grid=(b,),
        in_specs=[tok_spec()] + [rep_spec(a.shape) for a in args[1:]],
        out_specs=tok_spec(),
        compiler_params=pltpu.CompilerParams(
            dimension_semantics=("parallel",),   # v7x: one example per TensorCore
            vmem_limit_bytes=32 * 1024 * 1024,
        ),
    )(*args)


# ------------------------------ pure-JAX reference ------------------------------
def reference_forward(params, x):
    xn = _layer_norm(x, params['ln1_g'], params['ln1_b'])
    qkv = xn @ params['to_qkv_w']                            # (B, N, 3*inner)
    q, k, v = jnp.split(qkv, 3, axis=-1)

    def to_heads(t):
        bb, nn_, _ = t.shape
        return t.reshape(bb, nn_, HEADS, DIM_HEAD).transpose(0, 2, 1, 3)

    q, k, v = to_heads(q), to_heads(k), to_heads(v)
    dots = jnp.einsum('bhid,bhjd->bhij', q, k) * DIM_HEAD ** -0.5
    attn = jax.nn.softmax(dots, axis=-1)
    out = jnp.einsum('bhij,bhjd->bhid', attn, v)
    out = out.transpose(0, 2, 1, 3).reshape(x.shape[0], x.shape[1], INNER)
    y = x + out @ params['to_out_w'] + params['to_out_b']
    yn = _layer_norm(y, params['ln2_g'], params['ln2_b'])
    ff = _gelu_tanh(yn @ params['ff_w1'] + params['ff_b1']) @ params['ff_w2'] + params['ff_b2']
    return y + ff


# ------------------------------ parameter init ------------------------------
def init_params(key):
    ks = jax.random.split(key, 12)
    std = 0.1
    return {
        'ln1_g': 1.0 + 0.1 * jax.random.normal(ks[0], (1, DIM), jnp.float32),
        'ln1_b': 0.1 * jax.random.normal(ks[1], (1, DIM), jnp.float32),
        'to_qkv_w': std * jax.random.normal(ks[2], (DIM, 3 * INNER), jnp.float32),
        'to_out_w': std * jax.random.normal(ks[3], (INNER, DIM), jnp.float32),
        'to_out_b': 0.02 * jax.random.normal(ks[4], (1, DIM), jnp.float32),
        'ln2_g': 1.0 + 0.1 * jax.random.normal(ks[5], (1, DIM), jnp.float32),
        'ln2_b': 0.1 * jax.random.normal(ks[6], (1, DIM), jnp.float32),
        'ff_w1': std * jax.random.normal(ks[7], (DIM, MLP_DIM), jnp.float32),
        'ff_b1': 0.02 * jax.random.normal(ks[8], (1, MLP_DIM), jnp.float32),
        'ff_w2': std * jax.random.normal(ks[9], (MLP_DIM, DIM), jnp.float32),
        'ff_b2': 0.02 * jax.random.normal(ks[10], (1, DIM), jnp.float32),
    }


# ------------------------------------ main ------------------------------------
if __name__ == "__main__":
    root = jax.random.PRNGKey(0)
    k_params, k_x = jax.random.split(root)
    params = init_params(k_params)
    x = jax.random.normal(k_x, (BATCH, SEQ, DIM), jnp.float32)

    fwd = jax.jit(residual_attention_ff)
    out = jax.block_until_ready(fwd(params, x))

    assert out.shape == (BATCH, SEQ, DIM), out.shape
    assert bool(jnp.all(jnp.isfinite(out)))

    ref = reference_forward(params, x)
    max_err = float(jnp.max(jnp.abs(out - ref)))
    assert max_err < 1e-2, f"mismatch vs pure-JAX reference: {max_err}"

    print("KERNEL_OK")
</pallas_src>

<mosaic_0001>
module attributes {stable_mosaic.version = 11 : i64} {
  func.func @residual_block_kernel(%arg0: i32, %arg1: memref<1x17x64xf32, #tpu.memory_space<vmem>>, %arg2: memref<1x64xf32, #tpu.memory_space<vmem>>, %arg3: memref<1x64xf32, #tpu.memory_space<vmem>>, %arg4: memref<2x64x32xf32, #tpu.memory_space<vmem>>, %arg5: memref<2x64x32xf32, #tpu.memory_space<vmem>>, %arg6: memref<2x64x32xf32, #tpu.memory_space<vmem>>, %arg7: memref<2x32x64xf32, #tpu.memory_space<vmem>>, %arg8: memref<1x64xf32, #tpu.memory_space<vmem>>, %arg9: memref<1x64xf32, #tpu.memory_space<vmem>>, %arg10: memref<1x64xf32, #tpu.memory_space<vmem>>, %arg11: memref<64x256xf32, #tpu.memory_space<vmem>>, %arg12: memref<1x256xf32, #tpu.memory_space<vmem>>, %arg13: memref<256x64xf32, #tpu.memory_space<vmem>>, %arg14: memref<1x64xf32, #tpu.memory_space<vmem>>, %arg15: memref<1x17x64xf32, #tpu.memory_space<vmem>>) attributes {dimension_semantics = [#tpu.dimension_semantics<parallel>], iteration_bounds = array<i64: 2>, scalar_prefetch = 0 : i64, scratch_operands = 0 : i64, tpu.core_type = #tpu.core_type<tc>, window_params = [{transform_indices = @transform_0, window_bounds = array<i64: 1, 17, 64>}, {pipeline_mode = #tpu.pipeline_mode<synchronous>, transform_indices = @transform_1, window_bounds = array<i64: 1, 64>}, {pipeline_mode = #tpu.pipeline_mode<synchronous>, transform_indices = @transform_2, window_bounds = array<i64: 1, 64>}, {pipeline_mode = #tpu.pipeline_mode<synchronous>, transform_indices = @transform_3, window_bounds = array<i64: 2, 64, 32>}, {pipeline_mode = #tpu.pipeline_mode<synchronous>, transform_indices = @transform_4, window_bounds = array<i64: 2, 64, 32>}, {pipeline_mode = #tpu.pipeline_mode<synchronous>, transform_indices = @transform_5, window_bounds = array<i64: 2, 64, 32>}, {pipeline_mode = #tpu.pipeline_mode<synchronous>, transform_indices = @transform_6, window_bounds = array<i64: 2, 32, 64>}, {pipeline_mode = #tpu.pipeline_mode<synchronous>, transform_indices = @transform_7, window_bounds = array<i64: 1, 64>}, {pipeline_mode = #tpu.pipeline_mode<synchronous>, transform_indices = @transform_8, window_bounds = array<i64: 1, 64>}, {pipeline_mode = #tpu.pipeline_mode<synchronous>, transform_indices = @transform_9, window_bounds = array<i64: 1, 64>}, {pipeline_mode = #tpu.pipeline_mode<synchronous>, transform_indices = @transform_10, window_bounds = array<i64: 64, 256>}, {pipeline_mode = #tpu.pipeline_mode<synchronous>, transform_indices = @transform_11, window_bounds = array<i64: 1, 256>}, {pipeline_mode = #tpu.pipeline_mode<synchronous>, transform_indices = @transform_12, window_bounds = array<i64: 256, 64>}, {pipeline_mode = #tpu.pipeline_mode<synchronous>, transform_indices = @transform_13, window_bounds = array<i64: 1, 64>}, {transform_indices = @transform_14, window_bounds = array<i64: 1, 17, 64>}]} {
    %c0 = arith.constant 0 : index
    %c0_0 = arith.constant 0 : index
    %c0_1 = arith.constant 0 : index
    %0 = vector.load %arg1[%c0, %c0_0, %c0_1] : memref<1x17x64xf32, #tpu.memory_space<vmem>>, vector<1x17x64xf32>
    %1 = vector.shape_cast %0 : vector<1x17x64xf32> to vector<17x64xf32>
    %c0_2 = arith.constant 0 : index
    %c0_3 = arith.constant 0 : index
    %2 = vector.load %arg2[%c0_2, %c0_3] : memref<1x64xf32, #tpu.memory_space<vmem>>, vector<1x64xf32>
    %c0_4 = arith.constant 0 : index
    %c0_5 = arith.constant 0 : index
    %3 = vector.load %arg3[%c0_4, %c0_5] : memref<1x64xf32, #tpu.memory_space<vmem>>, vector<1x64xf32>
    %cst = arith.constant dense<0.000000e+00> : vector<17xf32>
    %4 = vector.multi_reduction <add>, %1, %cst [1] : vector<17x64xf32> to vector<17xf32>
    %5 = vector.shape_cast %4 : vector<17xf32> to vector<17x1xf32>
    %cst_6 = arith.constant 6.400000e+01 : f32
    %6 = vector.broadcast %cst_6 : f32 to vector<17x1xf32>
    %7 = arith.divf %5, %6 : vector<17x1xf32>
    %8 = vector.broadcast %7 : vector<17x1xf32> to vector<17x64xf32>
    %9 = arith.subf %1, %8 : vector<17x64xf32>
    %10 = arith.mulf %9, %9 : vector<17x64xf32>
    %cst_7 = arith.constant dense<0.000000e+00> : vector<17xf32>
    %11 = vector.multi_reduction <add>, %10, %cst_7 [1] : vector<17x64xf32> to vector<17xf32>
    %12 = vector.shape_cast %11 : vector<17xf32> to vector<17x1xf32>
    %cst_8 = arith.constant 6.400000e+01 : f32
    %13 = vector.broadcast %cst_8 : f32 to vector<17x1xf32>
    %14 = arith.divf %12, %13 : vector<17x1xf32>
    %cst_9 = arith.constant 9.99999974E-6 : f32
    %15 = vector.broadcast %cst_9 : f32 to vector<17x1xf32>
    %16 = arith.addf %14, %15 : vector<17x1xf32>
    %17 = math.rsqrt %16 : vector<17x1xf32>
    %18 = vector.broadcast %17 : vector<17x1xf32> to vector<17x64xf32>
    %19 = arith.mulf %9, %18 : vector<17x64xf32>
    %20 = vector.broadcast %2 : vector<1x64xf32> to vector<17x64xf32>
    %21 = arith.mulf %19, %20 : vector<17x64xf32>
    %22 = vector.broadcast %3 : vector<1x64xf32> to vector<17x64xf32>
    %23 = arith.addf %21, %22 : vector<17x64xf32>
    %cst_10 = arith.constant 0.000000e+00 : f32
    %24 = vector.broadcast %cst_10 : f32 to vector<17x64xf32>
    %c0_11 = arith.constant 0 : index
    %c0_12 = arith.constant 0 : index
    %c0_13 = arith.constant 0 : index
    %25 = vector.load %arg4[%c0_11, %c0_12, %c0_13] : memref<2x64x32xf32, #tpu.memory_space<vmem>>, vector<1x64x32xf32>
    %26 = vector.shape_cast %25 : vector<1x64x32xf32> to vector<64x32xf32>
    %cst_14 = arith.constant dense<0.000000e+00> : vector<17x32xf32>
    %27 = tpu.matmul %23, %26, %cst_14 {dimension_numbers = #tpu.dot_dimension_numbers<[1], [0], [0], [1], [0, 0, 1, 1], [], []>} : vector<17x64xf32>, vector<64x32xf32>, vector<17x32xf32> -> vector<17x32xf32>
    %c0_15 = arith.constant 0 : index
    %c0_16 = arith.constant 0 : index
    %c0_17 = arith.constant 0 : index
    %28 = vector.load %arg5[%c0_15, %c0_16, %c0_17] : memref<2x64x32xf32, #tpu.memory_space<vmem>>, vector<1x64x32xf32>
    %29 = vector.shape_cast %28 : vector<1x64x32xf32> to vector<64x32xf32>
    %cst_18 = arith.constant dense<0.000000e+00> : vector<17x32xf32>
    %30 = tpu.matmul %23, %29, %cst_18 {dimension_numbers = #tpu.dot_dimension_numbers<[1], [0], [0], [1], [0, 0, 1, 1], [], []>} : vector<17x64xf32>, vector<64x32xf32>, vector<17x32xf32> -> vector<17x32xf32>
    %c0_19 = arith.constant 0 : index
    %c0_20 = arith.constant 0 : index
    %c0_21 = arith.constant 0 : index
    %31 = vector.load %arg6[%c0_19, %c0_20, %c0_21] : memref<2x64x32xf32, #tpu.memory_space<vmem>>, vector<1x64x32xf32>
    %32 = vector.shape_cast %31 : vector<1x64x32xf32> to vector<64x32xf32>
    %cst_22 = arith.constant dense<0.000000e+00> : vector<17x32xf32>
    %33 = tpu.matmul %23, %32, %cst_22 {dimension_numbers = #tpu.dot_dimension_numbers<[1], [0], [0], [1], [0, 0, 1, 1], [], []>} : vector<17x64xf32>, vector<64x32xf32>, vector<17x32xf32> -> vector<17x32xf32>
    %34 = tpu.transpose %30, [1, 0] : vector<17x32xf32> -> vector<32x17xf32>
    %cst_23 = arith.constant dense<0.000000e+00> : vector<17x17xf32>
    %35 = tpu.matmul %27, %34, %cst_23 {dimension_numbers = #tpu.dot_dimension_numbers<[1], [0], [0], [1], [0, 0, 1, 1], [], []>} : vector<17x32xf32>, vector<32x17xf32>, vector<17x17xf32> -> vector<17x17xf32>
    %cst_24 = arith.constant 0.176776692 : f32
    %36 = vector.broadcast %cst_24 : f32 to vector<17x17xf32>
    %37 = arith.mulf %35, %36 : vector<17x17xf32>
    %cst_25 = arith.constant dense<0xFF800000> : vector<17xf32>
    %38 = vector.multi_reduction <maximumf>, %37, %cst_25 [1] : vector<17x17xf32> to vector<17xf32>
    %39 = vector.shape_cast %38 : vector<17xf32> to vector<17x1xf32>
    %40 = vector.broadcast %39 : vector<17x1xf32> to vector<17x17xf32>
    %41 = arith.subf %37, %40 : vector<17x17xf32>
    %42 = math.exp %41 : vector<17x17xf32>
    %cst_26 = arith.constant dense<0.000000e+00> : vector<17xf32>
    %43 = vector.multi_reduction <add>, %42, %cst_26 [1] : vector<17x17xf32> to vector<17xf32>
    %44 = vector.shape_cast %43 : vector<17xf32> to vector<17x1xf32>
    %45 = vector.broadcast %44 : vector<17x1xf32> to vector<17x17xf32>
    %46 = arith.divf %42, %45 : vector<17x17xf32>
    %cst_27 = arith.constant dense<0.000000e+00> : vector<17x32xf32>
    %47 = tpu.matmul %46, %33, %cst_27 {dimension_numbers = #tpu.dot_dimension_numbers<[1], [0], [0], [1], [0, 0, 1, 1], [], []>} : vector<17x17xf32>, vector<17x32xf32>, vector<17x32xf32> -> vector<17x32xf32>
    %c0_28 = arith.constant 0 : index
    %c0_29 = arith.constant 0 : index
    %c0_30 = arith.constant 0 : index
    %48 = vector.load %arg7[%c0_28, %c0_29, %c0_30] : memref<2x32x64xf32, #tpu.memory_space<vmem>>, vector<1x32x64xf32>
    %49 = vector.shape_cast %48 : vector<1x32x64xf32> to vector<32x64xf32>
    %cst_31 = arith.constant dense<0.000000e+00> : vector<17x64xf32>
    %50 = tpu.matmul %47, %49, %cst_31 {dimension_numbers = #tpu.dot_dimension_numbers<[1], [0], [0], [1], [0, 0, 1, 1], [], []>} : vector<17x32xf32>, vector<32x64xf32>, vector<17x64xf32> -> vector<17x64xf32>
    %51 = arith.addf %24, %50 : vector<17x64xf32>
    %c1 = arith.constant 1 : index
    %c0_32 = arith.constant 0 : index
    %c0_33 = arith.constant 0 : index
    %52 = vector.load %arg4[%c1, %c0_32, %c0_33] : memref<2x64x32xf32, #tpu.memory_space<vmem>>, vector<1x64x32xf32>
    %53 = vector.shape_cast %52 : vector<1x64x32xf32> to vector<64x32xf32>
    %cst_34 = arith.constant dense<0.000000e+00> : vector<17x32xf32>
    %54 = tpu.matmul %23, %53, %cst_34 {dimension_numbers = #tpu.dot_dimension_numbers<[1], [0], [0], [1], [0, 0, 1, 1], [], []>} : vector<17x64xf32>, vector<64x32xf32>, vector<17x32xf32> -> vector<17x32xf32>
    %c1_35 = arith.constant 1 : index
    %c0_36 = arith.constant 0 : index
    %c0_37 = arith.constant 0 : index
    %55 = vector.load %arg5[%c1_35, %c0_36, %c0_37] : memref<2x64x32xf32, #tpu.memory_space<vmem>>, vector<1x64x32xf32>
    %56 = vector.shape_cast %55 : vector<1x64x32xf32> to vector<64x32xf32>
    %cst_38 = arith.constant dense<0.000000e+00> : vector<17x32xf32>
    %57 = tpu.matmul %23, %56, %cst_38 {dimension_numbers = #tpu.dot_dimension_numbers<[1], [0], [0], [1], [0, 0, 1, 1], [], []>} : vector<17x64xf32>, vector<64x32xf32>, vector<17x32xf32> -> vector<17x32xf32>
    %c1_39 = arith.constant 1 : index
    %c0_40 = arith.constant 0 : index
    %c0_41 = arith.constant 0 : index
    %58 = vector.load %arg6[%c1_39, %c0_40, %c0_41] : memref<2x64x32xf32, #tpu.memory_space<vmem>>, vector<1x64x32xf32>
    %59 = vector.shape_cast %58 : vector<1x64x32xf32> to vector<64x32xf32>
    %cst_42 = arith.constant dense<0.000000e+00> : vector<17x32xf32>
    %60 = tpu.matmul %23, %59, %cst_42 {dimension_numbers = #tpu.dot_dimension_numbers<[1], [0], [0], [1], [0, 0, 1, 1], [], []>} : vector<17x64xf32>, vector<64x32xf32>, vector<17x32xf32> -> vector<17x32xf32>
    %61 = tpu.transpose %57, [1, 0] : vector<17x32xf32> -> vector<32x17xf32>
    %cst_43 = arith.constant dense<0.000000e+00> : vector<17x17xf32>
    %62 = tpu.matmul %54, %61, %cst_43 {dimension_numbers = #tpu.dot_dimension_numbers<[1], [0], [0], [1], [0, 0, 1, 1], [], []>} : vector<17x32xf32>, vector<32x17xf32>, vector<17x17xf32> -> vector<17x17xf32>
    %cst_44 = arith.constant 0.176776692 : f32
    %63 = vector.broadcast %cst_44 : f32 to vector<17x17xf32>
    %64 = arith.mulf %62, %63 : vector<17x17xf32>
    %cst_45 = arith.constant dense<0xFF800000> : vector<17xf32>
    %65 = vector.multi_reduction <maximumf>, %64, %cst_45 [1] : vector<17x17xf32> to vector<17xf32>
    %66 = vector.shape_cast %65 : vector<17xf32> to vector<17x1xf32>
    %67 = vector.broadcast %66 : vector<17x1xf32> to vector<17x17xf32>
    %68 = arith.subf %64, %67 : vector<17x17xf32>
    %69 = math.exp %68 : vector<17x17xf32>
    %cst_46 = arith.constant dense<0.000000e+00> : vector<17xf32>
    %70 = vector.multi_reduction <add>, %69, %cst_46 [1] : vector<17x17xf32> to vector<17xf32>
    %71 = vector.shape_cast %70 : vector<17xf32> to vector<17x1xf32>
    %72 = vector.broadcast %71 : vector<17x1xf32> to vector<17x17xf32>
    %73 = arith.divf %69, %72 : vector<17x17xf32>
    %cst_47 = arith.constant dense<0.000000e+00> : vector<17x32xf32>
    %74 = tpu.matmul %73, %60, %cst_47 {dimension_numbers = #tpu.dot_dimension_numbers<[1], [0], [0], [1], [0, 0, 1, 1], [], []>} : vector<17x17xf32>, vector<17x32xf32>, vector<17x32xf32> -> vector<17x32xf32>
    %c1_48 = arith.constant 1 : index
    %c0_49 = arith.constant 0 : index
    %c0_50 = arith.constant 0 : index
    %75 = vector.load %arg7[%c1_48, %c0_49, %c0_50] : memref<2x32x64xf32, #tpu.memory_space<vmem>>, vector<1x32x64xf32>
    %76 = vector.shape_cast %75 : vector<1x32x64xf32> to vector<32x64xf32>
    %cst_51 = arith.constant dense<0.000000e+00> : vector<17x64xf32>
    %77 = tpu.matmul %74, %76, %cst_51 {dimension_numbers = #tpu.dot_dimension_numbers<[1], [0], [0], [1], [0, 0, 1, 1], [], []>} : vector<17x32xf32>, vector<32x64xf32>, vector<17x64xf32> -> vector<17x64xf32>
    %78 = arith.addf %51, %77 : vector<17x64xf32>
    %79 = arith.addf %1, %78 : vector<17x64xf32>
    %c0_52 = arith.constant 0 : index
    %c0_53 = arith.constant 0 : index
    %80 = vector.load %arg8[%c0_52, %c0_53] : memref<1x64xf32, #tpu.memory_space<vmem>>, vector<1x64xf32>
    %81 = vector.broadcast %80 : vector<1x64xf32> to vector<17x64xf32>
    %82 = arith.addf %79, %81 : vector<17x64xf32>
    %c0_54 = arith.constant 0 : index
    %c0_55 = arith.constant 0 : index
    %83 = vector.load %arg9[%c0_54, %c0_55] : memref<1x64xf32, #tpu.memory_space<vmem>>, vector<1x64xf32>
    %c0_56 = arith.constant 0 : index
    %c0_57 = arith.constant 0 : index
    %84 = vector.load %arg10[%c0_56, %c0_57] : memref<1x64xf32, #tpu.memory_space<vmem>>, vector<1x64xf32>
    %cst_58 = arith.constant dense<0.000000e+00> : vector<17xf32>
    %85 = vector.multi_reduction <add>, %82, %cst_58 [1] : vector<17x64xf32> to vector<17xf32>
    %86 = vector.shape_cast %85 : vector<17xf32> to vector<17x1xf32>
    %cst_59 = arith.constant 6.400000e+01 : f32
    %87 = vector.broadcast %cst_59 : f32 to vector<17x1xf32>
    %88 = arith.divf %86, %87 : vector<17x1xf32>
    %89 = vector.broadcast %88 : vector<17x1xf32> to vector<17x64xf32>
    %90 = arith.subf %82, %89 : vector<17x64xf32>
    %91 = arith.mulf %90, %90 : vector<17x64xf32>
    %cst_60 = arith.constant dense<0.000000e+00> : vector<17xf32>
    %92 = vector.multi_reduction <add>, %91, %cst_60 [1] : vector<17x64xf32> to vector<17xf32>
    %93 = vector.shape_cast %92 : vector<17xf32> to vector<17x1xf32>
    %cst_61 = arith.constant 6.400000e+01 : f32
    %94 = vector.broadcast %cst_61 : f32 to vector<17x1xf32>
    %95 = arith.divf %93, %94 : vector<17x1xf32>
    %cst_62 = arith.constant 9.99999974E-6 : f32
    %96 = vector.broadcast %cst_62 : f32 to vector<17x1xf32>
    %97 = arith.addf %95, %96 : vector<17x1xf32>
    %98 = math.rsqrt %97 : vector<17x1xf32>
    %99 = vector.broadcast %98 : vector<17x1xf32> to vector<17x64xf32>
    %100 = arith.mulf %90, %99 : vector<17x64xf32>
    %101 = vector.broadcast %83 : vector<1x64xf32> to vector<17x64xf32>
    %102 = arith.mulf %100, %101 : vector<17x64xf32>
    %103 = vector.broadcast %84 : vector<1x64xf32> to vector<17x64xf32>
    %104 = arith.addf %102, %103 : vector<17x64xf32>
    %c0_63 = arith.constant 0 : index
    %c0_64 = arith.constant 0 : index
    %105 = vector.load %arg11[%c0_63, %c0_64] : memref<64x256xf32, #tpu.memory_space<vmem>>, vector<64x256xf32>
    %cst_65 = arith.constant dense<0.000000e+00> : vector<17x256xf32>
    %106 = tpu.matmul %104, %105, %cst_65 {dimension_numbers = #tpu.dot_dimension_numbers<[1], [0], [0], [1], [0, 0, 1, 1], [], []>} : vector<17x64xf32>, vector<64x256xf32>, vector<17x256xf32> -> vector<17x256xf32>
    %c0_66 = arith.constant 0 : index
    %c0_67 = arith.constant 0 : index
    %107 = vector.load %arg12[%c0_66, %c0_67] : memref<1x256xf32, #tpu.memory_space<vmem>>, vector<1x256xf32>
    %108 = vector.broadcast %107 : vector<1x256xf32> to vector<17x256xf32>
    %109 = arith.addf %106, %108 : vector<17x256xf32>
    %cst_68 = arith.constant 5.000000e-01 : f32
    %110 = vector.broadcast %cst_68 : f32 to vector<17x256xf32>
    %111 = arith.mulf %110, %109 : vector<17x256xf32>
    %cst_69 = arith.constant 4.471500e-02 : f32
    %112 = vector.broadcast %cst_69 : f32 to vector<17x256xf32>
    %113 = arith.mulf %112, %109 : vector<17x256xf32>
    %114 = arith.mulf %113, %109 : vector<17x256xf32>
    %115 = arith.mulf %114, %109 : vector<17x256xf32>
    %116 = arith.addf %109, %115 : vector<17x256xf32>
    %cst_70 = arith.constant 0.797884583 : f32
    %117 = vector.broadcast %cst_70 : f32 to vector<17x256xf32>
    %118 = arith.mulf %117, %116 : vector<17x256xf32>
    %119 = math.tanh %118 : vector<17x256xf32>
    %cst_71 = arith.constant 1.000000e+00 : f32
    %120 = vector.broadcast %cst_71 : f32 to vector<17x256xf32>
    %121 = arith.addf %120, %119 : vector<17x256xf32>
    %122 = arith.mulf %111, %121 : vector<17x256xf32>
    %c0_72 = arith.constant 0 : index
    %c0_73 = arith.constant 0 : index
    %123 = vector.load %arg13[%c0_72, %c0_73] : memref<256x64xf32, #tpu.memory_space<vmem>>, vector<256x64xf32>
    %cst_74 = arith.constant dense<0.000000e+00> : vector<17x64xf32>
    %124 = tpu.matmul %122, %123, %cst_74 {dimension_numbers = #tpu.dot_dimension_numbers<[1], [0], [0], [1], [0, 0, 1, 1], [], []>} : vector<17x256xf32>, vector<256x64xf32>, vector<17x64xf32> -> vector<17x64xf32>
    %c0_75 = arith.constant 0 : index
    %c0_76 = arith.constant 0 : index
    %125 = vector.load %arg14[%c0_75, %c0_76] : memref<1x64xf32, #tpu.memory_space<vmem>>, vector<1x64xf32>
    %126 = vector.broadcast %125 : vector<1x64xf32> to vector<17x64xf32>
    %127 = arith.addf %124, %126 : vector<17x64xf32>
    %128 = arith.addf %82, %127 : vector<17x64xf32>
    %c0_77 = arith.constant 0 : index
    %c0_78 = arith.constant 0 : index
    %c0_79 = arith.constant 0 : index
    %129 = vector.load %arg15[%c0_77, %c0_78, %c0_79] : memref<1x17x64xf32, #tpu.memory_space<vmem>>, vector<1x17x64xf32>
    %130 = vector.shape_cast %129 : vector<1x17x64xf32> to vector<17x64xf32>
    %131 = vector.shape_cast %128 : vector<17x64xf32> to vector<1x17x64xf32>
    tpu.vector_store %arg15[%c0_77, %c0_78, %c0_79], %131 {strides = array<i32>} : memref<1x17x64xf32, #tpu.memory_space<vmem>>, vector<1x17x64xf32>,
    return
  }
  func.func @transform_0(%arg0: i32) -> (i32, i32, i32) {
    %c0_i32 = arith.constant 0 : i32
    %c0_i32_0 = arith.constant 0 : i32
    %c0_i32_1 = arith.constant 0 : i32
    return %arg0, %c0_i32, %c0_i32_0 : i32, i32, i32
  }
  func.func @transform_1(%arg0: i32) -> (i32, i32) {
    %c0_i32 = arith.constant 0 : i32
    %c0_i32_0 = arith.constant 0 : i32
    %c0_i32_1 = arith.constant 0 : i32
    return %c0_i32, %c0_i32_0 : i32, i32
  }
  func.func @transform_2(%arg0: i32) -> (i32, i32) {
    %c0_i32 = arith.constant 0 : i32
    %c0_i32_0 = arith.constant 0 : i32
    %c0_i32_1 = arith.constant 0 : i32
    return %c0_i32, %c0_i32_0 : i32, i32
  }
  func.func @transform_3(%arg0: i32) -> (i32, i32, i32) {
    %c0_i32 = arith.constant 0 : i32
    %c0_i32_0 = arith.constant 0 : i32
    %c0_i32_1 = arith.constant 0 : i32
    %c0_i32_2 = arith.constant 0 : i32
    return %c0_i32, %c0_i32_0, %c0_i32_1 : i32, i32, i32
  }
  func.func @transform_4(%arg0: i32) -> (i32, i32, i32) {
    %c0_i32 = arith.constant 0 : i32
    %c0_i32_0 = arith.constant 0 : i32
    %c0_i32_1 = arith.constant 0 : i32
    %c0_i32_2 = arith.constant 0 : i32
    return %c0_i32, %c0_i32_0, %c0_i32_1 : i32, i32, i32
  }
  func.func @transform_5(%arg0: i32) -> (i32, i32, i32) {
    %c0_i32 = arith.constant 0 : i32
    %c0_i32_0 = arith.constant 0 : i32
    %c0_i32_1 = arith.constant 0 : i32
    %c0_i32_2 = arith.constant 0 : i32
    return %c0_i32, %c0_i32_0, %c0_i32_1 : i32, i32, i32
  }
  func.func @transform_6(%arg0: i32) -> (i32, i32, i32) {
    %c0_i32 = arith.constant 0 : i32
    %c0_i32_0 = arith.constant 0 : i32
    %c0_i32_1 = arith.constant 0 : i32
    %c0_i32_2 = arith.constant 0 : i32
    return %c0_i32, %c0_i32_0, %c0_i32_1 : i32, i32, i32
  }
  func.func @transform_7(%arg0: i32) -> (i32, i32) {
    %c0_i32 = arith.constant 0 : i32
    %c0_i32_0 = arith.constant 0 : i32
    %c0_i32_1 = arith.constant 0 : i32
    return %c0_i32, %c0_i32_0 : i32, i32
  }
  func.func @transform_8(%arg0: i32) -> (i32, i32) {
    %c0_i32 = arith.constant 0 : i32
    %c0_i32_0 = arith.constant 0 : i32
    %c0_i32_1 = arith.constant 0 : i32
    return %c0_i32, %c0_i32_0 : i32, i32
  }
  func.func @transform_9(%arg0: i32) -> (i32, i32) {
    %c0_i32 = arith.constant 0 : i32
    %c0_i32_0 = arith.constant 0 : i32
    %c0_i32_1 = arith.constant 0 : i32
    return %c0_i32, %c0_i32_0 : i32, i32
  }
  func.func @transform_10(%arg0: i32) -> (i32, i32) {
    %c0_i32 = arith.constant 0 : i32
    %c0_i32_0 = arith.constant 0 : i32
    %c0_i32_1 = arith.constant 0 : i32
    return %c0_i32, %c0_i32_0 : i32, i32
  }
  func.func @transform_11(%arg0: i32) -> (i32, i32) {
    %c0_i32 = arith.constant 0 : i32
    %c0_i32_0 = arith.constant 0 : i32
    %c0_i32_1 = arith.constant 0 : i32
    return %c0_i32, %c0_i32_0 : i32, i32
  }
  func.func @transform_12(%arg0: i32) -> (i32, i32) {
    %c0_i32 = arith.constant 0 : i32
    %c0_i32_0 = arith.constant 0 : i32
    %c0_i32_1 = arith.constant 0 : i32
    return %c0_i32, %c0_i32_0 : i32, i32
  }
  func.func @transform_13(%arg0: i32) -> (i32, i32) {
    %c0_i32 = arith.constant 0 : i32
    %c0_i32_0 = arith.constant 0 : i32
    %c0_i32_1 = arith.constant 0 : i32
    return %c0_i32, %c0_i32_0 : i32, i32
  }
  func.func @transform_14(%arg0: i32) -> (i32, i32, i32) {
    %c0_i32 = arith.constant 0 : i32
    %c0_i32_0 = arith.constant 0 : i32
    %c0_i32_1 = arith.constant 0 : i32
    return %arg0, %c0_i32, %c0_i32_0 : i32, i32, i32
  }
}

</mosaic_0001>

<bundles_post_ra>
// kernel: residual_attention_ff.1
= control target key start
LH: loop header
LB: loop body
LE: loop exit
PB: predicated region body
PF: predicated region fallthrough
CT: control target
= control target key end

     0   :  { %s1786_s29 = smov 0   ;;  %s2308_s0 = inlined_call_operand.vmem [shape: f32[2,17,64], index: 0, kind: input, shape index: {}]   ;;  %s2309_s1 = inlined_call_operand.vmem [shape: f32[1,64], index: 1, kind: input, shape index: {}]   ;;  %s2310_s2 = inlined_call_operand.vmem [shape: f32[1,64], index: 2, kind: input, shape index: {}]   ;;  %s2311_s3 = inlined_call_operand.vmem [shape: f32[2,64,32], index: 3, kind: input, shape index: {}]   ;;  %s2312_s4 = inlined_call_operand.vmem [shape: f32[2,64,32], index: 4, kind: input, shape index: {}]   ;;  %s2313_s5 = inlined_call_operand.vmem [shape: f32[2,64,32], index: 5, kind: input, shape index: {}]   ;;  %s2314_s6 = inlined_call_operand.vmem [shape: f32[2,32,64], index: 6, kind: input, shape index: {}]   ;;  %s2315_s7 = inlined_call_operand.vmem [shape: f32[1,64], index: 7, kind: input, shape index: {}]   ;;  %s2316_s8 = inlined_call_operand.vmem [shape: f32[1,64], index: 8, kind: input, shape index: {}]   ;;  %s2317_s9 = inlined_call_operand.vmem [shape: f32[1,64], index: 9, kind: input, shape index: {}]   ;;  %s2318_s10 = inlined_call_operand.vmem [shape: f32[64,256], index: 10, kind: input, shape index: {}]   ;;  %s2319_s11 = inlined_call_operand.vmem [shape: f32[1,256], index: 11, kind: input, shape index: {}]   ;;  %s2320_s12 = inlined_call_operand.vmem [shape: f32[256,64], index: 12, kind: input, shape index: {}]   ;;  %s2321_s13 = inlined_call_operand.vmem [shape: f32[1,64], index: 13, kind: input, shape index: {}]   ;;  %s2322_s14 = inlined_call_operand.vmem [shape: f32[2,17,64], index: 14, kind: output, shape index: {}]  }
   0x1 LB: > { %s1549_s30 = sadd.s32 4294967295, %s1708_s29   ;;  %p1553_p0 = scmp.ge.s32.totalorder %s1708_s29, 1  ;;  %s1708_s29 = sphi %s1786_s29, %s24_s29  }
   0x2   : > { %p412_p1 = scmp.lt.s32.totalorder %s1708_s29, 3 }
   0x4   : > { %p413_p2 = pnand %p1553_p0, %p412_p1 }
   0x5   : > { %p458_p3 = scmp.lt.s32.totalorder (!%p413_p2), %s1549_s30, 1 }
   0x6   : > { %416 = sbr.rel (%p413_p2) target bundleno = 2087 (0x827), region = 76 }
   0xb   : > { %s2324_s30 = smov (!%p458_p3, %s1549_s30), 1  ;;  %vm473_vm0 = vcmask 523264   ;;  %vm480_vm1 = vcmask 516096   ;;  %v1710_v6 = vmov 64.0   ;;  %v567_v28 = vld [vmem:[%s2311_s3 + $0x38] sm:$0xff]  ;;  %v566_v31 = vld [vmem:[%s2311_s3 + $0x30] sm:$0xff] }
   0xc   : > { %s1636_s15 = smul.u32 24, %s2324_s30  ;;  %1652 = vrcp.f32 %v1710_v6  ;;  %v610_v29 = vld [vmem:[%s2312_s4 + $0x38] sm:$0xff]  ;;  %585 = vmatpush.msra.mxu0 %v567_v28  ;;  %v609_v32 = vld [vmem:[%s2312_s4 + $0x30] sm:$0xff]  ;;  %v565_v34 = vld [vmem:[%s2311_s3 + $0x28] sm:$0xff]  ;;  %vm671_vm12 = vcmask 261120   ;;  %vm802_vm13 = vcmask 1040384  }
   0xd   : > { %v644_v30 = vld [vmem:[%s2313_s5 + $0x38] sm:$0xff]  ;;  %619 = vmatpush.msra.mxu1 %v610_v29  ;;  %v643_v33 = vld [vmem:[%s2313_s5 + $0x30] sm:$0xff]  ;;  %v608_v35 = vld [vmem:[%s2312_s4 + $0x28] sm:$0xff]  ;;  %vm719_vm14 = vcmask 138240   ;;  %vm726_vm15 = vcmask 131072  }
   0xe   : > { %s462_s18 = scalar_lea.vmem %s2308_s0, %s1636_s15  ;;  %653 = vmatpush.msra.mxu2 %v644_v30  ;;  %586 = vmatpush.msra.mxu0 %v566_v31  ;;  %v642_v36 = vld [vmem:[%s2313_s5 + $0x28] sm:$0xff]  ;;  %v564_v37 = vld [vmem:[%s2311_s3 + $0x20] sm:$0xff]  ;;  %v563_v40 = vld [vmem:[%s2311_s3 + $0x18] sm:$0xff]  ;;  %s467_s22 = scalar_lea.vmem %s2322_s14, %s1636_s15 }
   0xf   : > { %v1802_v0 = vld [vmem:[%s462_s18] sm:$0xff]  ;;  %v1804_v1 = vld [vmem:[%s462_s18 + $0x10] sm:$0x1]  ;;  %v1810_v4 = vld [vmem:[%s462_s18 + $0x8] sm:$0xff]  ;;  %620 = vmatpush.msra.mxu1 %v609_v32 }
  0x10   : > { %v474_v2 = vsel %vm473_vm0, %v1802_v0, 0.0  ;;  %v481_v3 = vsel %vm480_vm1, %v1804_v1, 0.0  ;;  %v477_v5 = vsel %vm473_vm0, %v1810_v4, 0.0  ;;  %654 = vmatpush.msra.mxu2 %v643_v33  ;;  %587 = vmatpush.msra.mxu0 %v565_v34  ;;  %v607_v38 = vld [vmem:[%s2312_s4 + $0x20] sm:$0xff]  ;;  %v606_v41 = vld [vmem:[%s2312_s4 + $0x18] sm:$0xff]  ;;  %v562_v43 = vld [vmem:[%s2311_s3 + $0x10] sm:$0xff] }
  0x11   : > { %475 = vadd.xlane.f32.xlu0 %v474_v2  ;;  %482 = vadd.xlane.f32.xlu1 %v481_v3  ;;  %v641_v39 = vld [vmem:[%s2313_s5 + $0x20] sm:$0xff]  ;;  %v640_v42 = vld [vmem:[%s2313_s5 + $0x18] sm:$0xff]  ;;  %v605_v44 = vld [vmem:[%s2312_s4 + $0x10] sm:$0xff] }
  0x12   : > { %v1653_v7 = vpop.eup %1652  ;;  %621 = vmatpush.msra.mxu1 %v608_v35  ;;  %655 = vmatpush.msra.mxu2 %v642_v36  ;;  %v639_v45 = vld [vmem:[%s2313_s5 + $0x10] sm:$0xff]  ;;  %v561_v46 = vld [vmem:[%s2311_s3 + $0x8] sm:$0xff]  ;;  %v560_v49 = vld [vmem:[%s2311_s3] sm:$0xff] }
  0x13   : > { %v485_v8 = vmul.f32 64.0, %v1653_v7  ;;  %vm489_vm2 = vweird.f32 %v1653_v7  ;;  %588 = vmatpush.msra.mxu0 %v564_v37  ;;  %v604_v47 = vld [vmem:[%s2312_s4 + $0x8] sm:$0xff]  ;;  %v603_v50 = vld [vmem:[%s2312_s4] sm:$0xff]  ;;  %v1582_v55 = vld [vmem:[%s2311_s3 + $0x78] sm:$0xff] }
  0x14   : > { %622 = vmatpush.msra.mxu1 %v607_v38  ;;  %656 = vmatpush.msra.mxu2 %v641_v39  ;;  %v638_v48 = vld [vmem:[%s2313_s5 + $0x8] sm:$0xff]  ;;  %v637_v51 = vld [vmem:[%s2313_s5] sm:$0xff]  ;;  %v1593_v56 = vld [vmem:[%s2312_s4 + $0x78] sm:$0xff] }
  0x15   : > { %v486_v9 = vsub.f32 1.0, %v485_v8  ;;  %589 = vmatpush.msra.mxu0 %v563_v40  ;;  %v1604_v57 = vld [vmem:[%s2313_s5 + $0x78] sm:$0xff]  ;;  %v1581_v59 = vld [vmem:[%s2311_s3 + $0x70] sm:$0xff]  ;;  %v1580_v63 = vld [vmem:[%s2311_s3 + $0x68] sm:$0xff] }
  0x16   : > { %623 = vmatpush.msra.mxu1 %v606_v41  ;;  %657 = vmatpush.msra.mxu2 %v640_v42  ;;  %v1592_v60 = vld [vmem:[%s2312_s4 + $0x70] sm:$0xff]  ;;  %v1591_v2 = vld [vmem:[%s2312_s4 + $0x68] sm:$0xff]  ;;  %v1590_v8 = vld [vmem:[%s2312_s4 + $0x60] sm:$0xff] }
  0x17   : > { %v487_v10 = vmul.f32 %v1653_v7, %v486_v9  ;;  %590 = vmatpush.msra.mxu0 %v562_v43  ;;  %v1603_v61 = vld [vmem:[%s2313_s5 + $0x70] sm:$0xff]  ;;  %v1602_v3 = vld [vmem:[%s2313_s5 + $0x68] sm:$0xff]  ;;  %v1601_v9 = vld [vmem:[%s2313_s5 + $0x60] sm:$0xff] }
  0x18   : > { %624 = vmatpush.msra.mxu1 %v605_v44  ;;  %658 = vmatpush.msra.mxu2 %v639_v45  ;;  %v1575_v29 = vld [vmem:[%s2311_s3 + $0x40] sm:$0xff] }
  0x19   : > { %478 = vadd.xlane.f32.xlu0 %v477_v5  ;;  %v488_v11 = vadd.f32 %v1653_v7, %v487_v10  ;;  %591 = vmatpush.msra.mxu0 %v561_v46  ;;  %v1586_v30 = vld [vmem:[%s2312_s4 + $0x40] sm:$0xff] }
  0x1a   : > { %625 = vmatpush.msra.mxu1 %v604_v47  ;;  %659 = vmatpush.msra.mxu2 %v638_v48  ;;  %v1597_v33 = vld [vmem:[%s2313_s5 + $0x40] sm:$0xff] }
  0x1b   : > { %v1814_v12 = vsel %vm489_vm2, %v1653_v7, %v488_v11  ;;  %592 = vmatpush.msra.mxu0 %v560_v49  ;;  %v1579_v7 = vld [vmem:[%s2311_s3 + $0x60] sm:$0xff] }
  0x1c   : > { %626 = vmatpush.msra.mxu1 %v603_v50  ;;  %660 = vmatpush.msra.mxu2 %v637_v51  ;;  %v1646_v36 = vld [vmem:[%s2309_s1] ss:$0 sm:$0xff] }
  0x1d   : > { %853 = vmatpush.msrb.mxu0 %v1582_v55  ;;  %v1647_v39 = vld [vmem:[%s2310_s2] ss:$0 sm:$0xff] }
  0x1e   : > { %888 = vmatpush.msrb.mxu1 %v1593_v56  ;;  %923 = vmatpush.msrb.mxu2 %v1604_v57 }
  0x1f   : > { %854 = vmatpush.msrb.mxu0 %v1581_v59 }
  0x20   : > { %889 = vmatpush.msrb.mxu1 %v1592_v60  ;;  %924 = vmatpush.msrb.mxu2 %v1603_v61 }
  0x21   : > { %855 = vmatpush.msrb.mxu0 %v1580_v63 }
  0x22   : > { %890 = vmatpush.msrb.mxu1 %v1591_v2  ;;  %925 = vmatpush.msrb.mxu2 %v1602_v3 }
  0x23   : > { %856 = vmatpush.msrb.mxu0 %v1579_v7 }
  0x24   : > { %891 = vmatpush.msrb.mxu1 %v1590_v8  ;;  %926 = vmatpush.msrb.mxu2 %v1601_v9 }
  0x84   : > { %v476_v13 = vpop.xlane.xlu0 %475  ;;  %v483_v17 = vpop.xlane.xlu1 %482 }
  0x85   : > { %v491_v14 = vmul.f32 %v1814_v12, %v476_v13  ;;  %v493_v21 = vmul.f32 %v1814_v12, %v483_v17  ;;  %v1578_v13 = vld [vmem:[%s2311_s3 + $0x58] sm:$0xff]  ;;  %v1577_v17 = vld [vmem:[%s2311_s3 + $0x50] sm:$0xff] }
  0x86   : > { %857 = vmatpush.msrb.mxu0 %v1578_v13 }
  0x87   : > { %v1818_v15 = vsub.f32 %v1802_v0, %v491_v14  ;;  %v1829_v23 = vsub.f32 %v1804_v1, %v493_v21  ;;  %v1589_v14 = vld [vmem:[%s2312_s4 + $0x58] sm:$0xff] }
  0x88   : > { %892 = vmatpush.msrb.mxu1 %v1589_v14  ;;  %858 = vmatpush.msrb.mxu0 %v1577_v17 }
  0x89   : > { %v497_v16 = vmul.f32 %v1818_v15, %v1818_v15  ;;  %v499_v26 = vmul.f32 %v1829_v23, %v1829_v23 }
  0x8b   : > { %v500_v18 = vsel %vm473_vm0, %v497_v16, 0.0  ;;  %v506_v27 = vsel %vm480_vm1, %v499_v26, 0.0  ;;  %v1600_v16 = vld [vmem:[%s2313_s5 + $0x58] sm:$0xff] }
  0x8c   : > { %501 = vadd.xlane.f32.xlu1 %v500_v18  ;;  %v479_v19 = vpop.xlane.xlu0 %478  ;;  %v1588_v18 = vld [vmem:[%s2312_s4 + $0x50] sm:$0xff]  ;;  %927 = vmatpush.msrb.mxu2 %v1600_v16 }
  0x8d   : > { %v492_v20 = vmul.f32 %v1814_v12, %v479_v19  ;;  %v1599_v19 = vld [vmem:[%s2313_s5 + $0x50] sm:$0xff]  ;;  %893 = vmatpush.msrb.mxu1 %v1588_v18 }
  0x8e   : > { %928 = vmatpush.msrb.mxu2 %v1599_v19 }
  0x8f   : > { %v1826_v22 = vsub.f32 %v1810_v4, %v492_v20 }
  0x91   : > { %v498_v24 = vmul.f32 %v1826_v22, %v1826_v22 }
  0x93   : > { %v503_v25 = vsel %vm473_vm0, %v498_v24, 0.0  ;;  %v1576_v24 = vld [vmem:[%s2311_s3 + $0x48] sm:$0xff] }
  0x94   : > { %504 = vadd.xlane.f32.xlu2 %v503_v25  ;;  %v1587_v25 = vld [vmem:[%s2312_s4 + $0x48] sm:$0xff]  ;;  %859 = vmatpush.msrb.mxu0 %v1576_v24 }
  0x95   : > { %894 = vmatpush.msrb.mxu1 %v1587_v25 }
  0x96   : > { %860 = vmatpush.msrb.mxu0 %v1575_v29 }
  0x97   : > { %895 = vmatpush.msrb.mxu1 %v1586_v30 }
  0x9c   : > { %507 = vadd.xlane.f32.xlu2 %v506_v27  ;;  %v1598_v27 = vld [vmem:[%s2313_s5 + $0x48] sm:$0xff] }
  0x9d   : > { %929 = vmatpush.msrb.mxu2 %v1598_v27 }
  0x9f   : > { %930 = vmatpush.msrb.mxu2 %v1597_v33 }
  0xff   : > { %v502_v52 = vpop.xlane.xlu1 %501 }
 0x100   : > { %v509_v53 = vmul.f32 %v502_v52, %v1814_v12 }
 0x102   : > { %v1910_v54 = vadd.f32 1e-05, %v509_v53 }
 0x104   : > { %1654 = vrsqrt.f32 %v1910_v54  ;;  %vm521_vm4 = vweird.f32 %v1910_v54 }
 0x107   : > { %v505_v58 = vpop.xlane.xlu2 %504 }
 0x108   : > { %v510_v62 = vmul.f32 %v505_v58, %v1814_v12 }
 0x10a   : > { %v1655_v5 = vpop.eup %1654  ;;  %v1941_v6 = vadd.f32 1e-05, %v510_v62 }
 0x10b   : > { %v516_v10 = vmul.f32 %v1655_v5, %v1910_v54  ;;  %vm522_vm3 = vweird.f32 %v1655_v5 }
 0x10c   : > { %1656 = vrsqrt.f32 %v1941_v6  ;;  %vm523_vm5 = vmor %vm521_vm4, %vm522_vm3  ;;  %vm531_vm7 = vweird.f32 %v1941_v6 }
 0x10d   : > { %v517_v11 = vmul.f32 %v1655_v5, %v516_v10 }
 0x10f   : > { %v518_v20 = vmul.f32 0.5, %v517_v11  ;;  %v508_v21 = vpop.xlane.xlu2 %507 }
 0x110   : > { %v511_v26 = vmul.f32 %v508_v21, %v1814_v12 }
 0x111   : > { %v519_v28 = vsub.f32 1.5, %v518_v20 }
 0x112   : > { %v1657_v31 = vpop.eup %1656  ;;  %v514_v32 = vadd.f32 1e-05, %v511_v26 }
 0x113   : > { %v520_v34 = vmul.f32 %v1655_v5, %v519_v28  ;;  %v526_v35 = vmul.f32 %v1657_v31, %v1941_v6  ;;  %vm532_vm6 = vweird.f32 %v1657_v31 }
 0x114   : > { %1658 = vrsqrt.f32 %v514_v32  ;;  %vm533_vm8 = vmor %vm531_vm7, %vm532_vm6  ;;  %vm541_vm10 = vweird.f32 %v514_v32 }
 0x115   : > { %v524_v37 = vsel %vm523_vm5, %v1655_v5, %v520_v34  ;;  %v527_v38 = vmul.f32 %v1657_v31, %v526_v35 }
 0x116   : > { %v545_v40 = vmul.f32 %v524_v37, %v1818_v15 }
 0x117   : > { %v528_v41 = vmul.f32 0.5, %v527_v38 }
 0x118   : > { %v551_v42 = vmul.f32 %v1646_v36, %v545_v40 }
 0x119   : > { %v529_v43 = vsub.f32 1.5, %v528_v41 }
 0x11a   : > { %v1659_v44 = vpop.eup %1658  ;;  %v557_v45 = vadd.f32 %v1647_v39, %v551_v42 }
 0x11b   : > { %v530_v46 = vmul.f32 %v1657_v31, %v529_v43  ;;  %v536_v47 = vmul.f32 %v1659_v44, %v514_v32  ;;  %vm542_vm9 = vweird.f32 %v1659_v44 }
 0x11c   : > { %1556 = vmatmul.msk.f32.vlgmr.msra.gmra.mxu0 %vm473_vm0, %v557_v45  ;;  %1559 = vmatmul.msk.f32.vlgmr.msra.gmra.mxu1 %vm473_vm0, %v557_v45  ;;  %vm543_vm11 = vmor %vm541_vm10, %vm542_vm9 }
 0x11d   : > { %v534_v48 = vsel %vm533_vm8, %v1657_v31, %v530_v46  ;;  %v537_v49 = vmul.f32 %v1659_v44, %v536_v47  ;;  %1562 = vmatmul.msk.f32.vlgmr.msra.gmra.mxu2 %vm473_vm0, %v557_v45 }
 0x11e   : > { %v546_v15 = vmul.f32 %v534_v48, %v1826_v22 }
 0x11f   : > { %v538_v50 = vmul.f32 0.5, %v537_v49 }
 0x120   : > { %v552_v51 = vmul.f32 %v1646_v36, %v546_v15 }
 0x121   : > { %v539_v52 = vsub.f32 1.5, %v538_v50 }
 0x122   : > { %v558_v53 = vadd.f32 %v1647_v39, %v552_v51 }
 0x123   : > { %v540_v54 = vmul.f32 %v1659_v44, %v539_v52 }
 0x124   : > { %1557 = vmatmul.msk.f32.gmra.mxu0 %vm473_vm0, %v558_v53  ;;  %1560 = vmatmul.msk.f32.gmra.mxu1 %vm473_vm0, %v558_v53 }
 0x125   : > { %v544_v55 = vsel %vm543_vm11, %v1659_v44, %v540_v54  ;;  %1563 = vmatmul.msk.f32.gmra.mxu2 %vm473_vm0, %v558_v53 }
 0x126   : > { %v547_v56 = vmul.f32 %v544_v55, %v1829_v23 }
 0x128   : > { %v553_v57 = vmul.f32 %v1646_v36, %v547_v56 }
 0x12a   : > { %v559_v58 = vadd.f32 %v1647_v39, %v553_v57 }
 0x12c   : > { %1558 = vmatmul.msk.f32.gmra.mxu0 %vm473_vm0, %v559_v58  ;;  %1561 = vmatmul.msk.f32.gmra.mxu1 %vm473_vm0, %v559_v58 }
 0x12d   : > { %1564 = vmatmul.msk.f32.gmra.mxu2 %vm473_vm0, %v559_v58 }
 0x134   : > { %1583 = vmatmul.msk.f32.vlgmr.msrb.gmra.mxu0 %vm473_vm0, %v557_v45  ;;  %1594 = vmatmul.msk.f32.vlgmr.msrb.gmra.mxu1 %vm473_vm0, %v557_v45 }
 0x135   : > { %1605 = vmatmul.msk.f32.vlgmr.msrb.gmra.mxu2 %vm473_vm0, %v557_v45 }
 0x13c   : > { %1584 = vmatmul.msk.f32.gmra.mxu0 %vm473_vm0, %v558_v53  ;;  %1595 = vmatmul.msk.f32.gmra.mxu1 %vm473_vm0, %v558_v53 }
 0x13d   : > { %1606 = vmatmul.msk.f32.gmra.mxu2 %vm473_vm0, %v558_v53 }
 0x144   : > { %1585 = vmatmul.msk.f32.gmra.mxu0 %vm473_vm0, %v559_v58  ;;  %1596 = vmatmul.msk.f32.gmra.mxu1 %vm473_vm0, %v559_v58 }
 0x145   : > { %1607 = vmatmul.msk.f32.gmra.mxu2 %vm473_vm0, %v559_v58 }
 0x199   : > { %v628_v22 = vpop.f32.mrf.mxu1  ;;  %v594_v62 = vpop.f32.mrf.mxu0 }
 0x1a0   : > { %v662_v23 = vpop.f32.mrf.mxu2 }
 0x1a1   : > { %v631_v59 = vpop.f32.mrf.mxu1  ;;  %v597_v6 = vpop.f32.mrf.mxu0 }
 0x1a8   : > { %v665_v60 = vpop.f32.mrf.mxu2 }
 0x1a9   : > { %v634_v61 = vpop.f32.mrf.mxu1  ;;  %v600_v9 = vpop.f32.mrf.mxu0 }
 0x1aa   : > { %1565 = vmatpush.xpose.msk.msra.mxu3 %vm671_vm12, %v634_v61 }
 0x1ae   : > { %1566 = vmatpush.xpose.msk.msra.mxu3 %vm671_vm12, %v631_v59 }
 0x1b0   : > { %v668_v63 = vpop.f32.mrf.mxu2 }
 0x1b1   : > { %v897_v2 = vpop.f32.mrf.mxu1 }
 0x1b2   : > { %1567 = vmatpush.xpose.msk.msra.mxu3 %vm671_vm12, %v628_v22 }
 0x1b5   : > { %1568 = vmatmul.msk.f32.vlgmr.msra.gmra.mxu3 %vm671_vm12, %v594_v62 }
 0x1b6   : > { %1571 = vmatpush.msk.msrb.mxu3 %vm802_vm13, %v668_v63 }
 0x1b8   : > { %820 = vmatpush.msrb.mxu3 %v665_v60  ;;  %v932_v3 = vpop.f32.mrf.mxu2 }
 0x1b9   : > { %v900_v5 = vpop.f32.mrf.mxu1 }
 0x1ba   : > { %821 = vmatpush.msrb.mxu3 %v662_v23 }
 0x1bd   : > { %1569 = vmatmul.msk.f32.gmra.mxu3 %vm671_vm12, %v597_v6  ;;  %v835_v6 = vld [vmem:[%s2314_s6 + $0x18] sm:$0xff] }
 0x1be   : > { %1159 = vmatpush.msra.mxu2 %v835_v6 }
 0x1c0   : > { %v935_v7 = vpop.f32.mrf.mxu2 }
 0x1c1   : > { %v903_v8 = vpop.f32.mrf.mxu1 }
 0x1c2   : > { %1608 = vmatpush.xpose.msk.msra.mxu3 %vm671_vm12, %v903_v8 }
 0x1c5   : > { %1570 = vmatmul.msk.f32.gmra.mxu3 %vm671_vm12, %v600_v9  ;;  %v833_v9 = vld [vmem:[%s2314_s6 + $0x8] sm:$0xff] }
 0x1c6   : > { %1609 = vmatpush.xpose.msk.msra.mxu3 %vm671_vm12, %v900_v5 }
 0x1c8   : > { %v938_v10 = vpop.f32.mrf.mxu2 }
 0x1c9   : > { %1614 = vmatpush.msk.msra.mxu0 %vm802_vm13, %v938_v10 }
 0x1ca   : > { %1610 = vmatpush.xpose.msk.msra.mxu3 %vm671_vm12, %v897_v2 }
 0x1cb   : > { %1086 = vmatpush.msra.mxu0 %v935_v7  ;;  %v834_v7 = vld [vmem:[%s2314_s6 + $0x10] sm:$0xff] }
 0x1cc   : > { %1160 = vmatpush.msra.mxu2 %v834_v7 }
 0x1cd   : > { %1087 = vmatpush.msra.mxu0 %v932_v3 }
 0x1ce   : > { %1161 = vmatpush.msra.mxu2 %v833_v9 }
 0x238   : > { %v707_v11 = vpop.f32.mrf.mxu3 }
 0x239   : > { %v716_v13 = vmul.f32 0.17677669, %v707_v11 }
 0x23b   : > { %v720_v14 = vsel %vm719_vm14, %v716_v13, -inf }
 0x23c   : > { %721 = vmax.xlane.f32.xlu0 %v720_v14 }
 0x240   : > { %v710_v16 = vpop.f32.mrf.mxu3 }
 0x241   : > { %v717_v17 = vmul.f32 0.17677669, %v710_v16  ;;  %v862_v16 = vpop.f32.mrf.mxu0 }
 0x243   : > { %v723_v18 = vsel %vm719_vm14, %v717_v17, -inf }
 0x244   : > { %724 = vmax.xlane.f32.xlu1 %v723_v18 }
 0x248   : > { %v713_v19 = vpop.f32.mrf.mxu3 }
 0x249   : > { %v718_v20 = vmul.f32 0.17677669, %v713_v19  ;;  %v832_v19 = vld [vmem:[%s2314_s6] sm:$0xff] }
 0x24a   : > { %1162 = vmatpush.msra.mxu2 %v832_v19 }
 0x24b   : > { %v727_v21 = vsel %vm726_vm15, %v718_v20, -inf }
 0x24c   : > { %728 = vmax.xlane.f32.xlu2 %v727_v21 }
 0x2af   : > { %v722_v24 = vpop.xlane.xlu0 %721 }
 0x2b0   : > { %v730_v25 = vsub.f32 %v716_v13, %v722_v24 }
 0x2b2   : > { %v733_v26 = vmul.f32 1.442695, %v730_v25 }
 0x2b4   : > { %1660 = vpow2.f32 %v733_v26 }
 0x2b7   : > { %v725_v27 = vpop.xlane.xlu1 %724 }
 0x2b8   : > { %v731_v28 = vsub.f32 %v717_v17, %v725_v27  ;;  %v865_v17 = vpop.f32.mrf.mxu0 }
 0x2ba   : > { %v1661_v29 = vpop.eup %1660  ;;  %v735_v30 = vmul.f32 1.442695, %v731_v28 }
 0x2bb   : > { %v739_v31 = vsel %vm719_vm14, %v1661_v29, 0.0 }
 0x2bc   : > { %1662 = vpow2.f32 %v735_v30  ;;  %740 = vadd.xlane.f32.xlu0 %v739_v31 }
 0x2bf   : > { %v729_v32 = vpop.xlane.xlu2 %728 }
 0x2c0   : > { %v732_v33 = vsub.f32 %v718_v20, %v729_v32  ;;  %v868_v18 = vpop.f32.mrf.mxu0 }
 0x2c2   : > { %v1663_v34 = vpop.eup %1662  ;;  %v737_v35 = vmul.f32 1.442695, %v732_v33 }
 0x2c3   : > { %v742_v36 = vsel %vm719_vm14, %v1663_v34, 0.0 }
 0x2c4   : > { %1664 = vpow2.f32 %v737_v35  ;;  %743 = vadd.xlane.f32.xlu1 %v742_v36 }
 0x2ca   : > { %v1665_v37 = vpop.eup %1664 }
 0x2cb   : > { %v745_v38 = vsel %vm726_vm15, %v1665_v37, 0.0 }
 0x2cc   : > { %746 = vadd.xlane.f32.xlu2 %v745_v38 }
 0x32f   : > { %v741_v39 = vpop.xlane.xlu0 %740 }
 0x330   : > { %1666 = vrcp.f32 %v741_v39  ;;  %v759_v44 = vand.u32 2147483648, %v741_v39  ;;  %v757_v46 = vand.u32 2147483647, %v741_v39  ;;  %vm753_vm3 = vweird.f32 %v741_v39 }
 0x332   : > { %v760_v49 = vor.u32 1.1754944e-38, %v759_v44  ;;  %vm758_vm5 = vcmp.eq.f32.partialorder %v757_v46, 8.507059e+37 }
 0x336   : > { %v1667_v40 = vpop.eup %1666 }
 0x337   : > { %v749_v41 = vmul.f32 %v1667_v40, %v741_v39  ;;  %v744_v42 = vpop.xlane.xlu1 %743  ;;  %vm754_vm2 = vweird.f32 %v1667_v40 }
 0x338   : > { %1668 = vrcp.f32 %v744_v42  ;;  %vm755_vm4 = vmor %vm753_vm3, %vm754_vm2  ;;  %v774_v55 = vand.u32 2147483648, %v744_v42  ;;  %v772_v57 = vand.u32 2147483647, %v744_v42  ;;  %vm768_vm7 = vweird.f32 %v744_v42 }
 0x339   : > { %v750_v43 = vsub.f32 1.0, %v749_v41 }
 0x33a   : > { %v775_v23 = vor.u32 1.1754944e-38, %v774_v55  ;;  %vm773_vm9 = vcmp.eq.f32.partialorder %v772_v57, 8.507059e+37  ;;  %v1618_v55 = vld [vmem:[%s2314_s6 + $0x20] sm:$0xff] }
 0x33b   : > { %v751_v45 = vmul.f32 %v1667_v40, %v750_v43 }
 0x33d   : > { %v752_v47 = vadd.f32 %v1667_v40, %v751_v45 }
 0x33e   : > { %v1669_v48 = vpop.eup %1668 }
 0x33f   : > { %v764_v15 = vmul.f32 %v1669_v48, %v744_v42  ;;  %v747_v50 = vpop.xlane.xlu2 %746  ;;  %v756_v51 = vsel %vm755_vm4, %v1667_v40, %v752_v47  ;;  %vm769_vm6 = vweird.f32 %v1669_v48 }
 0x340   : > { %1670 = vrcp.f32 %v747_v50  ;;  %v761_v52 = vsel %vm758_vm5, %v760_v49, %v756_v51  ;;  %vm770_vm8 = vmor %vm768_vm7, %vm769_vm6  ;;  %v789_v2 = vand.u32 2147483648, %v747_v50  ;;  %v787_v5 = vand.u32 2147483647, %v747_v50  ;;  %v1619_v51 = vld [vmem:[%s2314_s6 + $0x28] sm:$0xff] }
 0x341   : > { %v765_v53 = vsub.f32 1.0, %v764_v15  ;;  %v762_v54 = vmul.f32 %v1661_v29, %v761_v52  ;;  %vm783_vm11 = vweird.f32 %v747_v50  ;;  %v1621_v15 = vld [vmem:[%s2314_s6 + $0x38] sm:$0xff] }
 0x342   : > { %v790_v10 = vor.u32 1.1754944e-38, %v789_v2  ;;  %vm788_vm2 = vcmp.eq.f32.partialorder %v787_v5, 8.507059e+37  ;;  %1124 = vmatpush.msra.mxu1 %v1621_v15 }
 0x343   : > { %v766_v56 = vmul.f32 %v1669_v48, %v765_v53  ;;  %1572 = vmatmul.msk.f32.vlgmr.msrb.gmra.mxu3 %vm719_vm14, %v762_v54 }
 0x345   : > { %v767_v58 = vadd.f32 %v1669_v48, %v766_v56 }
 0x346   : > { %v1671_v22 = vpop.eup %1670 }
 0x347   : > { %v779_v59 = vmul.f32 %v1671_v22, %v747_v50  ;;  %v771_v60 = vsel %vm770_vm8, %v1669_v48, %v767_v58  ;;  %vm784_vm10 = vweird.f32 %v1671_v22  ;;  %v1620_v50 = vld [vmem:[%s2314_s6 + $0x30] sm:$0xff] }
 0x348   : > { %v776_v61 = vsel %vm773_vm9, %v775_v23, %v771_v60  ;;  %vm785_vm13 = vmor %vm783_vm11, %vm784_vm10  ;;  %1125 = vmatpush.msra.mxu1 %v1620_v50 }
 0x349   : > { %v780_v62 = vsub.f32 1.0, %v779_v59  ;;  %v777_v63 = vmul.f32 %v1663_v34, %v776_v61 }
 0x34a   : > { %1126 = vmatpush.msra.mxu1 %v1619_v51 }
 0x34b   : > { %v781_v3 = vmul.f32 %v1671_v22, %v780_v62  ;;  %1573 = vmatmul.msk.f32.gmra.mxu3 %vm719_vm14, %v777_v63 }
 0x34c   : > { %1127 = vmatpush.msra.mxu1 %v1618_v55 }
 0x34d   : > { %v782_v8 = vadd.f32 %v1671_v22, %v781_v3 }
 0x34f   : > { %v786_v11 = vsel %vm785_vm13, %v1671_v22, %v782_v8 }
 0x350   : > { %v791_v13 = vsel %vm788_vm2, %v790_v10, %v786_v11 }
 0x351   : > { %v792_v14 = vmul.f32 %v1665_v37, %v791_v13 }
 0x353   : > { %1574 = vmatmul.msk.f32.gmra.mxu3 %vm719_vm14, %v792_v14 }
 0x35b   : > { %1611 = vmatmul.msk.f32.vlgmr.msra.gmra.mxu3 %vm671_vm12, %v862_v16 }
 0x363   : > { %1612 = vmatmul.msk.f32.gmra.mxu3 %vm671_vm12, %v865_v17 }
 0x36b   : > { %1613 = vmatmul.msk.f32.gmra.mxu3 %vm671_vm12, %v868_v18 }
 0x3c6   : > { %v823_v20 = vpop.f32.mrf.mxu3 }
 0x3c7   : > { %1625 = vmatmul.msk.f32.vlgmr.msra.gmra.mxu2 %vm671_vm12, %v823_v20 }
 0x3ce   : > { %v826_v21 = vpop.f32.mrf.mxu3 }
 0x3cf   : > { %1626 = vmatmul.msk.f32.gmra.mxu2 %vm671_vm12, %v826_v21 }
 0x3d6   : > { %v829_v24 = vpop.f32.mrf.mxu3 }
 0x3d7   : > { %1627 = vmatmul.msk.f32.gmra.mxu2 %vm671_vm12, %v829_v24 }
 0x3de   : > { %v976_v25 = vpop.f32.mrf.mxu3 }
 0x3df   : > { %v985_v26 = vmul.f32 0.17677669, %v976_v25 }
 0x3e1   : > { %v988_v27 = vsel %vm719_vm14, %v985_v26, -inf }
 0x3e2   : > { %989 = vmax.xlane.f32.xlu0 %v988_v27 }
 0x3e6   : > { %v979_v28 = vpop.f32.mrf.mxu3 }
 0x3e7   : > { %v986_v29 = vmul.f32 0.17677669, %v979_v28 }
 0x3e9   : > { %v991_v30 = vsel %vm719_vm14, %v986_v29, -inf }
 0x3ea   : > { %992 = vmax.xlane.f32.xlu1 %v991_v30 }
 0x3ee   : > { %v982_v31 = vpop.f32.mrf.mxu3 }
 0x3ef   : > { %v987_v32 = vmul.f32 0.17677669, %v982_v31 }
 0x3f1   : > { %v994_v33 = vsel %vm726_vm15, %v987_v32, -inf }
 0x3f2   : > { %995 = vmax.xlane.f32.xlu2 %v994_v33 }
 0x455   : > { %v990_v34 = vpop.xlane.xlu0 %989 }
 0x456   : > { %v997_v35 = vsub.f32 %v985_v26, %v990_v34 }
 0x458   : > { %v1000_v36 = vmul.f32 1.442695, %v997_v35  ;;  %v1648_v35 = vld [vmem:[%s2315_s7] ss:$0 sm:$0xff] }
 0x45a   : > { %1672 = vpow2.f32 %v1000_v36 }
 0x45d   : > { %v993_v37 = vpop.xlane.xlu1 %992 }
 0x45e   : > { %v998_v38 = vsub.f32 %v986_v29, %v993_v37 }
 0x460   : > { %v1673_v39 = vpop.eup %1672  ;;  %v1002_v40 = vmul.f32 1.442695, %v998_v38 }
 0x461   : > { %v1006_v41 = vsel %vm719_vm14, %v1673_v39, 0.0 }
 0x462   : > { %1674 = vpow2.f32 %v1002_v40  ;;  %1007 = vadd.xlane.f32.xlu0 %v1006_v41 }
 0x465   : > { %v996_v42 = vpop.xlane.xlu2 %995 }
 0x466   : > { %v999_v43 = vsub.f32 %v987_v32, %v996_v42  ;;  %v1164_v32 = vpop.f32.mrf.mxu2 }
 0x468   : > { %v1675_v44 = vpop.eup %1674  ;;  %v1004_v45 = vmul.f32 1.442695, %v999_v43 }
 0x469   : > { %v1009_v46 = vsel %vm719_vm14, %v1675_v44, 0.0 }
 0x46a   : > { %1676 = vpow2.f32 %v1004_v45  ;;  %1010 = vadd.xlane.f32.xlu1 %v1009_v46 }
 0x46e   : > { %v1167_v38 = vpop.f32.mrf.mxu2 }
 0x470   : > { %v2064_v47 = vpop.eup %1676 }
 0x471   : > { %v1012_v48 = vsel %vm726_vm15, %v2064_v47, 0.0 }
 0x472   : > { %1013 = vadd.xlane.f32.xlu2 %v1012_v48 }
 0x476   : > { %v1170_v45 = vpop.f32.mrf.mxu2 }
 0x4d5   : > { %v1008_v49 = vpop.xlane.xlu0 %1007 }
 0x4d6   : > { %1678 = vrcp.f32 %v1008_v49  ;;  %v1026_v57 = vand.u32 2147483648, %v1008_v49  ;;  %v1024_v22 = vand.u32 2147483647, %v1008_v49  ;;  %vm1020_vm3 = vweird.f32 %v1008_v49 }
 0x4d8   : > { %v1027_v60 = vor.u32 1.1754944e-38, %v1026_v57  ;;  %vm1025_vm5 = vcmp.eq.f32.partialorder %v1024_v22, 8.507059e+37 }
 0x4dc   : > { %v1679_v52 = vpop.eup %1678 }
 0x4dd   : > { %v1016_v53 = vmul.f32 %v1679_v52, %v1008_v49  ;;  %v1011_v54 = vpop.xlane.xlu1 %1010  ;;  %vm1021_vm15 = vweird.f32 %v1679_v52 }
 0x4de   : > { %1680 = vrcp.f32 %v1011_v54  ;;  %vm1022_vm4 = vmor %vm1020_vm3, %vm1021_vm15  ;;  %v1041_v6 = vand.u32 2147483648, %v1011_v54  ;;  %v1039_v8 = vand.u32 2147483647, %v1011_v54  ;;  %vm1035_vm7 = vweird.f32 %v1011_v54 }
 0x4df   : > { %v1017_v56 = vsub.f32 1.0, %v1016_v53 }
 0x4e0   : > { %v1042_v11 = vor.u32 1.1754944e-38, %v1041_v6  ;;  %vm1040_vm9 = vcmp.eq.f32.partialorder %v1039_v8, 8.507059e+37  ;;  %v1272_v6 = vld [vmem:[%s2318_s10 + $0x48] sm:$0xff]  ;;  %v1270_v8 = vld [vmem:[%s2318_s10 + $0x38] sm:$0xff] }
 0x4e1   : > { %v1018_v58 = vmul.f32 %v1679_v52, %v1017_v56 }
 0x4e3   : > { %v1019_v23 = vadd.f32 %v1679_v52, %v1018_v58 }
 0x4e4   : > { %v1681_v59 = vpop.eup %1680 }
 0x4e5   : > { %v1023_v61 = vsel %vm1022_vm4, %v1679_v52, %v1019_v23  ;;  %v1031_v62 = vmul.f32 %v1681_v59, %v1011_v54  ;;  %v1014_v63 = vpop.xlane.xlu2 %1013  ;;  %vm1036_vm6 = vweird.f32 %v1681_v59 }
 0x4e6   : > { %v1028_v2 = vsel %vm1025_vm5, %v1027_v60, %v1023_v61  ;;  %1682 = vrcp.f32 %v1014_v63  ;;  %vm1037_vm8 = vmor %vm1035_vm7, %vm1036_vm6  ;;  %v1056_v19 = vand.u32 2147483648, %v1014_v63  ;;  %v1054_v21 = vand.u32 2147483647, %v1014_v63  ;;  %v1277_v60 = vld [vmem:[%s2318_s10 + $0x70] sm:$0xff]  ;;  %v1278_v61 = vld [vmem:[%s2318_s10 + $0x78] sm:$0xff] }
 0x4e7   : > { %v1032_v3 = vsub.f32 1.0, %v1031_v62  ;;  %v1029_v5 = vmul.f32 %v1673_v39, %v1028_v2  ;;  %vm1050_vm11 = vweird.f32 %v1014_v63  ;;  %1302 = vmatpush.msrb.mxu3 %v1277_v60  ;;  %1328 = vmatpush.msrb.mxu0 %v1278_v61  ;;  %v1275_v62 = vld [vmem:[%s2318_s10 + $0x60] sm:$0xff]  ;;  %v1273_v2 = vld [vmem:[%s2318_s10 + $0x50] sm:$0xff] }
 0x4e8   : > { %v1057_v25 = vor.u32 1.1754944e-38, %v1056_v19  ;;  %vm1055_vm2 = vcmp.eq.f32.partialorder %v1054_v21, 8.507059e+37 }
 0x4e9   : > { %v1033_v7 = vmul.f32 %v1681_v59, %v1032_v3  ;;  %1615 = vmatmul.msk.f32.vlgmr.msra.gmra.mxu0 %vm719_vm14, %v1029_v5  ;;  %1303 = vmatpush.msrb.mxu3 %v1275_v62  ;;  %v1274_v3 = vld [vmem:[%s2318_s10 + $0x58] sm:$0xff]  ;;  %v1271_v5 = vld [vmem:[%s2318_s10 + $0x40] sm:$0xff] }
 0x4eb   : > { %v1034_v9 = vadd.f32 %v1681_v59, %v1033_v7  ;;  %1304 = vmatpush.msrb.mxu3 %v1273_v2  ;;  %v1269_v7 = vld [vmem:[%s2318_s10 + $0x30] sm:$0xff] }
 0x4ec   : > { %v1683_v10 = vpop.eup %1682  ;;  %v1426_v2 = vld [vmem:[%s2320_s12 + $0xd0] sm:$0xff] }
 0x4ed   : > { %v1046_v13 = vmul.f32 %v1683_v10, %v1014_v63  ;;  %v1038_v14 = vsel %vm1037_vm8, %v1681_v59, %v1034_v9  ;;  %vm1051_vm10 = vweird.f32 %v1683_v10  ;;  %v1276_v63 = vld [vmem:[%s2318_s10 + $0x68] sm:$0xff]  ;;  %1305 = vmatpush.msrb.mxu3 %v1271_v5  ;;  %v1267_v9 = vld [vmem:[%s2318_s10 + $0x20] sm:$0xff] }
 0x4ee   : > { %v1043_v16 = vsel %vm1040_vm9, %v1042_v11, %v1038_v14  ;;  %vm1052_vm13 = vmor %vm1050_vm11, %vm1051_vm10  ;;  %1329 = vmatpush.msrb.mxu0 %v1276_v63  ;;  %v1265_v11 = vld [vmem:[%s2318_s10 + $0x10] sm:$0xff]  ;;  %v1263_v14 = vld [vmem:[%s2318_s10] sm:$0xff] }
 0x4ef   : > { %v1047_v17 = vsub.f32 1.0, %v1046_v13  ;;  %v1044_v18 = vmul.f32 %v1675_v44, %v1043_v16  ;;  %1306 = vmatpush.msrb.mxu3 %v1269_v7  ;;  %v1266_v13 = vld [vmem:[%s2318_s10 + $0x18] sm:$0xff]  ;;  %v1264_v16 = vld [vmem:[%s2318_s10 + $0x8] sm:$0xff]  ;;  %v1424_v7 = vld [vmem:[%s2320_s12 + $0xc0] sm:$0xff] }
 0x4f0   : > { %1330 = vmatpush.msrb.mxu0 %v1274_v3  ;;  %v1427_v63 = vld [vmem:[%s2320_s12 + $0xd8] sm:$0xff]  ;;  %v1412_v3 = vld [vmem:[%s2320_s12 + $0x60] sm:$0xff]  ;;  %v1425_v5 = vld [vmem:[%s2320_s12 + $0xc8] sm:$0xff] }
 0x4f1   : > { %v1048_v20 = vmul.f32 %v1683_v10, %v1047_v17  ;;  %1616 = vmatmul.msk.f32.gmra.mxu0 %vm719_vm14, %v1044_v18  ;;  %1307 = vmatpush.msrb.mxu3 %v1267_v9  ;;  %v1423_v9 = vld [vmem:[%s2320_s12 + $0xb8] sm:$0xff] }
 0x4f2   : > { %1331 = vmatpush.msrb.mxu0 %v1272_v6  ;;  %v1411_v6 = vld [vmem:[%s2320_s12 + $0x58] sm:$0xff] }
 0x4f3   : > { %v1049_v24 = vadd.f32 %v1683_v10, %v1048_v20  ;;  %1308 = vmatpush.msrb.mxu3 %v1265_v11  ;;  %v1422_v11 = vld [vmem:[%s2320_s12 + $0xb0] sm:$0xff] }
 0x4f4   : > { %1332 = vmatpush.msrb.mxu0 %v1270_v8  ;;  %v1410_v8 = vld [vmem:[%s2320_s12 + $0x50] sm:$0xff] }
 0x4f5   : > { %v1053_v26 = vsel %vm1052_vm13, %v1683_v10, %v1049_v24  ;;  %v1268_v10 = vld [vmem:[%s2318_s10 + $0x28] sm:$0xff]  ;;  %1309 = vmatpush.msrb.mxu3 %v1263_v14 }
 0x4f6   : > { %v1058_v27 = vsel %vm1055_vm2, %v1057_v25, %v1053_v26  ;;  %1333 = vmatpush.msrb.mxu0 %v1268_v10  ;;  %v1409_v10 = vld [vmem:[%s2320_s12 + $0x48] sm:$0xff] }
 0x4f7   : > { %v1059_v28 = vmul.f32 %v2064_v47, %v1058_v27  ;;  %v1431_v27 = vld [vmem:[%s2320_s12 + $0xf8] sm:$0xff]  ;;  %v1421_v14 = vld [vmem:[%s2320_s12 + $0xa8] sm:$0xff] }
 0x4f8   : > { %1334 = vmatpush.msrb.mxu0 %v1266_v13  ;;  %1462 = vmatpush.msrb.mxu2 %v1431_v27  ;;  %v1408_v13 = vld [vmem:[%s2320_s12 + $0x40] sm:$0xff] }
 0x4f9   : > { %1617 = vmatmul.msk.f32.gmra.mxu0 %vm719_vm14, %v1059_v28  ;;  %v1430_v28 = vld [vmem:[%s2320_s12 + $0xf0] sm:$0xff]  ;;  %v1416_v27 = vld [vmem:[%s2320_s12 + $0x80] sm:$0xff] }
 0x4fa   : > { %1335 = vmatpush.msrb.mxu0 %v1264_v16  ;;  %1463 = vmatpush.msrb.mxu2 %v1430_v28  ;;  %v1407_v16 = vld [vmem:[%s2320_s12 + $0x38] sm:$0xff]  ;;  %v1402_v28 = vld [vmem:[%s2320_s12 + $0x10] sm:$0xff] }
 0x566   : > { %v1089_v29 = vpop.f32.mrf.mxu0 }
 0x567   : > { %1622 = vmatmul.msk.f32.vlgmr.msra.gmra.mxu1 %vm671_vm12, %v1089_v29 }
 0x56e   : > { %v1092_v30 = vpop.f32.mrf.mxu0 }
 0x56f   : > { %1623 = vmatmul.msk.f32.gmra.mxu1 %vm671_vm12, %v1092_v30  ;;  %v1415_v30 = vld [vmem:[%s2320_s12 + $0x78] sm:$0xff] }
 0x570   : > { %1436 = vmatpush.msrb.mxu1 %v1415_v30  ;;  %v1279_v30 = vld [vmem:[%s2319_s11] sm:$0x3] }
 0x576   : > { %v1095_v31 = vpop.f32.mrf.mxu0 }
 0x577   : > { %1624 = vmatmul.msk.f32.gmra.mxu1 %vm671_vm12, %v1095_v31  ;;  %v1429_v31 = vld [vmem:[%s2320_s12 + $0xe8] sm:$0xff] }
 0x578   : > { %1464 = vmatpush.msrb.mxu2 %v1429_v31  ;;  %v1400_v31 = vld [vmem:[%s2320_s12] sm:$0xff] }
 0x5e4   : > { %v1129_v33 = vpop.f32.mrf.mxu1 }
 0x5e5   : > { %v1165_v34 = vadd.f32 %v1164_v32, %v1129_v33 }
 0x5e7   : > { %v1173_v36 = vadd.f32 %v1165_v34, %v1802_v0 }
 0x5e9   : > { %v2091_v37 = vadd.f32 %v1648_v35, %v1173_v36 }
 0x5eb   : > { %v1185_v39 = vsel %vm473_vm0, %v2091_v37, 0.0 }
 0x5ec   : > { %1186 = vadd.xlane.f32.xlu0 %v1185_v39  ;;  %v1132_v40 = vpop.f32.mrf.mxu1 }
 0x5ed   : > { %v1168_v41 = vadd.f32 %v1167_v38, %v1132_v40 }
 0x5ef   : > { %v1174_v42 = vadd.f32 %v1168_v41, %v1810_v4 }
 0x5f1   : > { %v2096_v43 = vadd.f32 %v1648_v35, %v1174_v42  ;;  %v1649_v42 = vld [vmem:[%s2316_s8] ss:$0 sm:$0xff] }
 0x5f3   : > { %v1188_v44 = vsel %vm473_vm0, %v2096_v43, 0.0 }
 0x5f4   : > { %1189 = vadd.xlane.f32.xlu1 %v1188_v44  ;;  %v1135_v46 = vpop.f32.mrf.mxu1 }
 0x5f5   : > { %v1171_v0 = vadd.f32 %v1170_v45, %v1135_v46  ;;  %v1650_v46 = vld [vmem:[%s2317_s9] ss:$0 sm:$0xff] }
 0x5f7   : > { %v1175_v47 = vadd.f32 %v1171_v0, %v1804_v1 }
 0x5f9   : > { %v2101_v48 = vadd.f32 %v1648_v35, %v1175_v47  ;;  %v1428_v35 = vld [vmem:[%s2320_s12 + $0xe0] sm:$0xff] }
 0x5fa   : > { %1465 = vmatpush.msrb.mxu2 %v1428_v35 }
 0x5fb   : > { %v1191_v49 = vsel %vm480_vm1, %v2101_v48, 0.0 }
 0x5fc   : > { %1192 = vadd.xlane.f32.xlu2 %v1191_v49  ;;  %1466 = vmatpush.msrb.mxu2 %v1427_v63 }
 0x5fe   : > { %1467 = vmatpush.msrb.mxu2 %v1426_v2 }
 0x600   : > { %1468 = vmatpush.msrb.mxu2 %v1425_v5 }
 0x602   : > { %1469 = vmatpush.msrb.mxu2 %v1424_v7 }
 0x604   : > { %1470 = vmatpush.msrb.mxu2 %v1423_v9 }
 0x606   : > { %1471 = vmatpush.msrb.mxu2 %v1422_v11 }
 0x608   : > { %1472 = vmatpush.msrb.mxu2 %v1421_v14 }
 0x65f   : > { %v1187_v15 = vpop.xlane.xlu0 %1186 }
 0x660   : > { %v1194_v4 = vmul.f32 %v1187_v15, %v1814_v12 }
 0x662   : > { %v2107_v50 = vsub.f32 %v2091_v37, %v1194_v4 }
 0x664   : > { %v1200_v51 = vmul.f32 %v2107_v50, %v2107_v50 }
 0x666   : > { %v1203_v52 = vsel %vm473_vm0, %v1200_v51, 0.0 }
 0x667   : > { %1204 = vadd.xlane.f32.xlu0 %v1203_v52  ;;  %v1190_v53 = vpop.xlane.xlu1 %1189 }
 0x668   : > { %v1195_v1 = vmul.f32 %v1190_v53, %v1814_v12 }
 0x66a   : > { %v2114_v54 = vsub.f32 %v2096_v43, %v1195_v1 }
 0x66c   : > { %v1201_v55 = vmul.f32 %v2114_v54, %v2114_v54 }
 0x66e   : > { %v1206_v56 = vsel %vm473_vm0, %v1201_v55, 0.0 }
 0x66f   : > { %1207 = vadd.xlane.f32.xlu1 %v1206_v56  ;;  %v1193_v57 = vpop.xlane.xlu2 %1192 }
 0x670   : > { %v1196_v58 = vmul.f32 %v1193_v57, %v1814_v12 }
 0x672   : > { %v2121_v22 = vsub.f32 %v2101_v48, %v1196_v58 }
 0x674   : > { %v1202_v23 = vmul.f32 %v2121_v22, %v2121_v22 }
 0x676   : > { %v1209_v59 = vsel %vm480_vm1, %v1202_v23, 0.0 }
 0x677   : > { %1210 = vadd.xlane.f32.xlu2 %v1209_v59 }
 0x6da   : > { %v1205_v17 = vpop.xlane.xlu0 %1204 }
 0x6db   : > { %v1212_v18 = vmul.f32 %v1205_v17, %v1814_v12  ;;  %v1420_v17 = vld [vmem:[%s2320_s12 + $0xa0] sm:$0xff] }
 0x6dc   : > { %1473 = vmatpush.msrb.mxu2 %v1420_v17 }
 0x6dd   : > { %v1215_v19 = vadd.f32 1e-05, %v1212_v18  ;;  %v1406_v18 = vld [vmem:[%s2320_s12 + $0x30] sm:$0xff] }
 0x6df   : > { %1684 = vrsqrt.f32 %v1215_v19  ;;  %vm1224_vm14 = vweird.f32 %v1215_v19 }
 0x6e2   : > { %v1208_v20 = vpop.xlane.xlu1 %1207 }
 0x6e3   : > { %v1213_v21 = vmul.f32 %v1208_v20, %v1814_v12  ;;  %v1405_v20 = vld [vmem:[%s2320_s12 + $0x28] sm:$0xff] }
 0x6e5   : > { %v1685_v24 = vpop.eup %1684  ;;  %v1216_v25 = vadd.f32 1e-05, %v1213_v21  ;;  %v1418_v21 = vld [vmem:[%s2320_s12 + $0x90] sm:$0xff] }
 0x6e6   : > { %v1219_v26 = vmul.f32 %v1685_v24, %v1215_v19  ;;  %vm1225_vm12 = vweird.f32 %v1685_v24  ;;  %v1419_v19 = vld [vmem:[%s2320_s12 + $0x98] sm:$0xff] }
 0x6e7   : > { %1686 = vrsqrt.f32 %v1216_v25  ;;  %vm1226_vm15 = vmor %vm1224_vm14, %vm1225_vm12  ;;  %vm1234_vm4 = vweird.f32 %v1216_v25  ;;  %1474 = vmatpush.msrb.mxu2 %v1419_v19 }
 0x6e8   : > { %v1220_v29 = vmul.f32 %v1685_v24, %v1219_v26  ;;  %v1403_v26 = vld [vmem:[%s2320_s12 + $0x18] sm:$0xff] }
 0x6e9   : > { %1475 = vmatpush.msrb.mxu2 %v1418_v21 }
 0x6ea   : > { %v1221_v32 = vmul.f32 0.5, %v1220_v29  ;;  %v1211_v33 = vpop.xlane.xlu2 %1210  ;;  %v1401_v29 = vld [vmem:[%s2320_s12 + $0x8] sm:$0xff] }
 0x6eb   : > { %v1214_v34 = vmul.f32 %v1211_v33, %v1814_v12 }
 0x6ec   : > { %v1222_v36 = vsub.f32 1.5, %v1221_v32  ;;  %v1282_v32 = vperm.slane %v1279_v30, 1 }
 0x6ed   : > { %v1687_v38 = vpop.eup %1686  ;;  %v1217_v39 = vadd.f32 1e-05, %v1214_v34 }
 0x6ee   : > { %v1223_v40 = vmul.f32 %v1685_v24, %v1222_v36  ;;  %v1229_v41 = vmul.f32 %v1687_v38, %v1216_v25  ;;  %vm1235_vm3 = vweird.f32 %v1687_v38  ;;  %v1417_v25 = vld [vmem:[%s2320_s12 + $0x88] sm:$0xff]  ;;  %v1281_v36 = vperm.slane %v1279_v30, 0 }
 0x6ef   : > { %1688 = vrsqrt.f32 %v1217_v39  ;;  %vm1236_vm5 = vmor %vm1234_vm4, %vm1235_vm3  ;;  %vm1244_vm7 = vweird.f32 %v1217_v39  ;;  %1476 = vmatpush.msrb.mxu2 %v1417_v25 }
 0x6f0   : > { %v1227_v12 = vsel %vm1226_vm15, %v1685_v24, %v1223_v40  ;;  %v1230_v44 = vmul.f32 %v1687_v38, %v1229_v41  ;;  %v1404_v24 = vld [vmem:[%s2320_s12 + $0x20] sm:$0xff] }
 0x6f1   : > { %v1248_v45 = vmul.f32 %v1227_v12, %v2107_v50  ;;  %1477 = vmatpush.msrb.mxu2 %v1416_v27 }
 0x6f2   : > { %v1231_v0 = vmul.f32 0.5, %v1230_v44 }
 0x6f3   : > { %v1254_v47 = vmul.f32 %v1649_v42, %v1248_v45 }
 0x6f4   : > { %v1232_v49 = vsub.f32 1.5, %v1231_v0 }
 0x6f5   : > { %v1689_v15 = vpop.eup %1688  ;;  %v1260_v4 = vadd.f32 %v1650_v46, %v1254_v47 }
 0x6f6   : > { %v1233_v51 = vmul.f32 %v1687_v38, %v1232_v49  ;;  %v1239_v52 = vmul.f32 %v1689_v15, %v1217_v39  ;;  %vm1245_vm6 = vweird.f32 %v1689_v15 }
 0x6f7   : > { %1628 = vmatmul.msk.f32.vlgmr.msrb.gmra.mxu3 %vm473_vm0, %v1260_v4  ;;  %1631 = vmatmul.msk.f32.vlgmr.msrb.gmra.mxu0 %vm473_vm0, %v1260_v4  ;;  %vm1246_vm8 = vmor %vm1244_vm7, %vm1245_vm6 }
 0x6f8   : > { %v1237_v53 = vsel %vm1236_vm5, %v1687_v38, %v1233_v51  ;;  %v1240_v50 = vmul.f32 %v1689_v15, %v1239_v52 }
 0x6f9   : > { %v1249_v1 = vmul.f32 %v1237_v53, %v2114_v54  ;;  %v1414_v54 = vld [vmem:[%s2320_s12 + $0x70] sm:$0xff] }
 0x6fa   : > { %v1241_v55 = vmul.f32 0.5, %v1240_v50  ;;  %1437 = vmatpush.msrb.mxu1 %v1414_v54 }
 0x6fb   : > { %v1255_v56 = vmul.f32 %v1649_v42, %v1249_v1 }
 0x6fc   : > { %v1242_v57 = vsub.f32 1.5, %v1241_v55 }
 0x6fd   : > { %v1261_v58 = vadd.f32 %v1650_v46, %v1255_v56 }
 0x6fe   : > { %v1243_v23 = vmul.f32 %v1689_v15, %v1242_v57 }
 0x6ff   : > { %1629 = vmatmul.msk.f32.gmra.mxu3 %vm473_vm0, %v1261_v58  ;;  %1632 = vmatmul.msk.f32.gmra.mxu0 %vm473_vm0, %v1261_v58 }
 0x700   : > { %v1247_v59 = vsel %vm1246_vm8, %v1689_v15, %v1243_v23 }
 0x701   : > { %v1250_v60 = vmul.f32 %v1247_v59, %v2121_v22  ;;  %v1413_v22 = vld [vmem:[%s2320_s12 + $0x68] sm:$0xff] }
 0x702   : > { %1438 = vmatpush.msrb.mxu1 %v1413_v22 }
 0x703   : > { %v1256_v61 = vmul.f32 %v1649_v42, %v1250_v60 }
 0x704   : > { %1439 = vmatpush.msrb.mxu1 %v1412_v3 }
 0x705   : > { %v1262_v62 = vadd.f32 %v1650_v46, %v1256_v61 }
 0x706   : > { %1440 = vmatpush.msrb.mxu1 %v1411_v6 }
 0x707   : > { %1630 = vmatmul.msk.f32.gmra.mxu3 %vm473_vm0, %v1262_v62  ;;  %1633 = vmatmul.msk.f32.gmra.mxu0 %vm473_vm0, %v1262_v62 }
 0x708   : > { %1441 = vmatpush.msrb.mxu1 %v1410_v8 }
 0x70a   : > { %1442 = vmatpush.msrb.mxu1 %v1409_v10 }
 0x70c   : > { %1443 = vmatpush.msrb.mxu1 %v1408_v13 }
 0x70e   : > { %1444 = vmatpush.msrb.mxu1 %v1407_v16 }
 0x710   : > { %1445 = vmatpush.msrb.mxu1 %v1406_v18 }
 0x712   : > { %1446 = vmatpush.msrb.mxu1 %v1405_v20 }
 0x714   : > { %1447 = vmatpush.msrb.mxu1 %v1404_v24 }
 0x716   : > { %1448 = vmatpush.msrb.mxu1 %v1403_v26 }
 0x718   : > { %1449 = vmatpush.msrb.mxu1 %v1402_v28 }
 0x71a   : > { %1450 = vmatpush.msrb.mxu1 %v1401_v29 }
 0x71c   : > { %1451 = vmatpush.msrb.mxu1 %v1400_v31 }
 0x774   : > { %v1337_v33 = vpop.f32.mrf.mxu0 }
 0x775   : > { %v1338_v34 = vadd.f32 %v1337_v33, %v1282_v32 }
 0x777   : > { %v1353_v35 = vmul.f32 0.044715, %v1338_v34  ;;  %v1347_v60 = vmul.f32 0.5, %v1338_v34 }
 0x779   : > { %v1359_v38 = vmul.f32 %v1353_v35, %v1338_v34 }
 0x77a   : > { %v1311_v39 = vpop.f32.mrf.mxu3 }
 0x77b   : > { %v1365_v40 = vmul.f32 %v1359_v38, %v1338_v34  ;;  %v1312_v41 = vadd.f32 %v1311_v39, %v1281_v36 }
 0x77c   : > { %v1340_v42 = vpop.f32.mrf.mxu0 }
 0x77d   : > { %v1352_v12 = vmul.f32 0.044715, %v1312_v41  ;;  %v1341_v44 = vadd.f32 %v1340_v42, %v1282_v32  ;;  %v1371_v45 = vadd.f32 %v1365_v40, %v1338_v34  ;;  %v1346_v10 = vmul.f32 0.5, %v1312_v41  ;;  %v1651_v40 = vld [vmem:[%s2321_s13] ss:$0 sm:$0xff] }
 0x77f   : > { %v1358_v46 = vmul.f32 %v1352_v12, %v1312_v41  ;;  %v1377_v0 = vmul.f32 0.7978846, %v1371_v45  ;;  %v1355_v47 = vmul.f32 0.044715, %v1341_v44  ;;  %v1349_v19 = vmul.f32 0.5, %v1341_v44 }
 0x781   : > { %v1364_v49 = vmul.f32 %v1358_v46, %v1312_v41  ;;  %1690 = vtanh.f32 %v1377_v0  ;;  %v1361_v15 = vmul.f32 %v1355_v47, %v1341_v44 }
 0x782   : > { %v1314_v4 = vpop.f32.mrf.mxu3 }
 0x783   : > { %v1315_v51 = vadd.f32 %v1314_v4, %v1281_v36  ;;  %v1370_v52 = vadd.f32 %v1364_v49, %v1312_v41  ;;  %v1367_v53 = vmul.f32 %v1361_v15, %v1341_v44 }
 0x784   : > { %v1343_v50 = vpop.f32.mrf.mxu0 }
 0x785   : > { %v1344_v1 = vadd.f32 %v1343_v50, %v1282_v32  ;;  %v1376_v55 = vmul.f32 0.7978846, %v1370_v52  ;;  %v1373_v56 = vadd.f32 %v1367_v53, %v1341_v44  ;;  %v1354_v57 = vmul.f32 0.044715, %v1315_v51 }
 0x786   : > { %v1348_v29 = vmul.f32 0.5, %v1315_v51 }
 0x787   : > { %v1691_v58 = vpop.eup %1690  ;;  %1692 = vtanh.f32 %v1376_v55  ;;  %v1379_v23 = vmul.f32 0.7978846, %v1373_v56  ;;  %v1357_v59 = vmul.f32 0.044715, %v1344_v1  ;;  %v1360_v62 = vmul.f32 %v1354_v57, %v1315_v51 }
 0x788   : > { %v1389_v61 = vadd.f32 1.0, %v1691_v58  ;;  %v1351_v31 = vmul.f32 0.5, %v1344_v1 }
 0x789   : > { %1694 = vtanh.f32 %v1379_v23  ;;  %v1363_v54 = vmul.f32 %v1357_v59, %v1344_v1  ;;  %v1366_v2 = vmul.f32 %v1360_v62, %v1315_v51 }
 0x78a   : > { %v1317_v63 = vpop.f32.mrf.mxu3  ;;  %v1395_v22 = vmul.f32 %v1389_v61, %v1347_v60 }
 0x78b   : > { %v1318_v3 = vadd.f32 %v1317_v63, %v1281_v36  ;;  %v1369_v5 = vmul.f32 %v1363_v54, %v1344_v1  ;;  %v1372_v6 = vadd.f32 %v1366_v2, %v1315_v51 }
 0x78c   : > { %1478 = vmatmul.f32.vlgmr.msrb.gmra.mxu2 %v1395_v22 }
 0x78d   : > { %v1693_v7 = vpop.eup %1692  ;;  %v1375_v8 = vadd.f32 %v1369_v5, %v1344_v1  ;;  %v1356_v9 = vmul.f32 0.044715, %v1318_v3  ;;  %v1378_v13 = vmul.f32 0.7978846, %v1372_v6  ;;  %v1350_v36 = vmul.f32 0.5, %v1318_v3 }
 0x78e   : > { %v1388_v11 = vadd.f32 1.0, %v1693_v7 }
 0x78f   : > { %v1695_v14 = vpop.eup %1694  ;;  %v1381_v16 = vmul.f32 0.7978846, %v1375_v8  ;;  %v1362_v17 = vmul.f32 %v1356_v9, %v1318_v3  ;;  %1696 = vtanh.f32 %v1378_v13 }
 0x790   : > { %v1394_v18 = vmul.f32 %v1388_v11, %v1346_v10  ;;  %v1391_v20 = vadd.f32 1.0, %v1695_v14 }
 0x791   : > { %1698 = vtanh.f32 %v1381_v16  ;;  %v1368_v21 = vmul.f32 %v1362_v17, %v1318_v3 }
 0x792   : > { %1452 = vmatmul.f32.vlgmr.msrb.gmra.mxu1 %v1394_v18  ;;  %v1397_v24 = vmul.f32 %v1391_v20, %v1349_v19 }
 0x793   : > { %v1374_v25 = vadd.f32 %v1368_v21, %v1318_v3 }
 0x794   : > { %1481 = vmatmul.f32.gmra.mxu2 %v1397_v24 }
 0x795   : > { %v1380_v26 = vmul.f32 0.7978846, %v1374_v25  ;;  %v1697_v27 = vpop.eup %1696 }
 0x796   : > { %v1390_v30 = vadd.f32 1.0, %v1697_v27 }
 0x797   : > { %v1699_v28 = vpop.eup %1698  ;;  %1700 = vtanh.f32 %v1380_v26 }
 0x798   : > { %v1393_v32 = vadd.f32 1.0, %v1699_v28  ;;  %v1396_v33 = vmul.f32 %v1390_v30, %v1348_v29 }
 0x79a   : > { %v1399_v34 = vmul.f32 %v1393_v32, %v1351_v31  ;;  %1455 = vmatmul.f32.gmra.mxu1 %v1396_v33 }
 0x79c   : > { %1484 = vmatmul.f32.gmra.mxu2 %v1399_v34 }
 0x79d   : > { %v1701_v35 = vpop.eup %1700 }
 0x79e   : > { %v1392_v38 = vadd.f32 1.0, %v1701_v35 }
 0x7a0   : > { %v1398_v39 = vmul.f32 %v1392_v38, %v1350_v36 }
 0x7a2   : > { %1458 = vmatmul.f32.gmra.mxu1 %v1398_v39 }
 0x80f   : > { %v1453_v41 = vpop.f32.mrf.mxu1  ;;  %v1479_v42 = vpop.f32.mrf.mxu2 }
 0x810   : > { %v1454_v12 = vadd.f32 %v1651_v40, %v1453_v41 }
 0x812   : > { %v1480_v44 = vadd.f32 %v1479_v42, %v1454_v12 }
 0x814   : > { %v1488_v45 = vadd.f32 %v1480_v44, %v2091_v37 }
 0x816   : > { %1491 = vst.msk [vmem:[%s467_s22] sm:$0xff] %vm473_vm0, %v1488_v45 }
 0x817   : > { %v1456_v46 = vpop.f32.mrf.mxu1  ;;  %v1482_v0 = vpop.f32.mrf.mxu2 }
 0x818   : > { %v1457_v47 = vadd.f32 %v1651_v40, %v1456_v46 }
 0x81a   : > { %v1483_v49 = vadd.f32 %v1482_v0, %v1457_v47 }
 0x81c   : > { %v1489_v15 = vadd.f32 %v1483_v49, %v2096_v43 }
 0x81e   : > { %1492 = vst.msk [vmem:[%s467_s22 + $0x8] sm:$0xff] %vm473_vm0, %v1489_v15 }
 0x81f   : > { %v1459_v4 = vpop.f32.mrf.mxu1  ;;  %v1485_v52 = vpop.f32.mrf.mxu2 }
 0x820   : > { %v1460_v51 = vadd.f32 %v1651_v40, %v1459_v4 }
 0x822   : > { %v1486_v53 = vadd.f32 %v1485_v52, %v1460_v51 }
 0x824   : > { %v1490_v50 = vadd.f32 %v1486_v53, %v2101_v48 }
 0x826   : > { %1493 = vst.msk [vmem:[%s467_s22 + $0x10] sm:$0x1] %vm480_vm1, %v1490_v50 }
 0x827 PF: > { %s24_s29 = sadd.s32 1, %s1708_s29  }
 0x828   : > { %p21_p4 = scmp.ge.s32.totalorder %s24_s29, 4  }
 0x82a   :  { %23 = sbr.rel (!%p21_p4) target bundleno = 1 (0x1), region = 110 }

</bundles_post_ra>
